<compile_context>
chip_gen: v5e
topology: v5e:2x2
jax: 0.10.0
libtpu: 0.0.40
codegen_flags: <defaults>
</compile_context>

<pallas_src>
import jax
import jax.numpy as jnp
from jax.experimental import pallas as pl
from jax.experimental.pallas import tpu as pltpu


# --------------------------------------------------------------------------------------
# Small helpers
# --------------------------------------------------------------------------------------
def _round_up(x, m):
    return ((x + m - 1) // m) * m


def _pick_tile(s, candidates):
    for t in candidates:
        if t <= s and s % t == 0:
            return t
    return s  # full-extent block (legal even when not a multiple of 8/128)


def _vmem_budget_bytes():
    # ~75% of physical VMEM (leave headroom for Mosaic scratch / semaphores / double buffers).
    try:
        info = pltpu.get_tpu_info()
        for name in ("vmem_capacity_bytes", "vmem_size_bytes", "vmem_bytes"):
            cap = getattr(info, name, None)
            if cap:
                return int(0.75 * int(cap))
    except Exception:
        pass
    return 48 << 20  # conservative fallback that fits every generation (v7x: 64 MiB/TC)


def _wspec(shape, index_map, buffered):
    # Grid-invariant blocks: single-buffered when supported (saves VMEM, no pipelining value).
    if buffered:
        return pl.BlockSpec(shape, index_map, pipeline_mode=pl.Buffered(1))
    return pl.BlockSpec(shape, index_map)


# --------------------------------------------------------------------------------------
# Kernel 1: normalize (per-batch affine from GroupNorm stats) + fused QKV projection
# --------------------------------------------------------------------------------------
def _norm_qkv_kernel(x_ref, scale_ref, shift_ref, w_ref, bias_ref, q_ref, k_ref, v_ref):
    # x_ref:     (1, tS, Cp) f32 tokens (zero-padded channels)
    # scale_ref: (1, 1, Cp)  f32  = gamma * rsqrt(var + eps)   (per batch, per channel)
    # shift_ref: (1, 1, Cp)  f32  = beta - mean * scale
    # w_ref:     (Cp, 3*Cp)  bf16 fused pre-transposed QKV weight (q columns pre-scaled)
    # bias_ref:  (1, 3*Cp)   f32  fused bias (q part pre-scaled)
    # q/k/v:     (1, tS, Cp) bf16 outputs
    cp = q_ref.shape[-1]
    xn = x_ref[0] * scale_ref[0] + shift_ref[0]                      # (tS, Cp) f32
    qkv = jnp.dot(xn.astype(w_ref.dtype), w_ref[...],
                  preferred_element_type=jnp.float32) + bias_ref[...]  # (tS, 3*Cp) f32
    q_ref[0] = qkv[:, :cp].astype(q_ref.dtype)
    k_ref[0] = qkv[:, cp:2 * cp].astype(k_ref.dtype)
    v_ref[0] = qkv[:, 2 * cp:].astype(v_ref.dtype)


# --------------------------------------------------------------------------------------
# Kernel 2: flash attention (online softmax) + output projection + residual
# --------------------------------------------------------------------------------------
def _flash_attn_out_kernel(q_ref, k_ref, v_ref, xres_ref, wout_ref, bout_ref,
                           out_ref, m_sc, l_sc, acc_sc):
    ki = pl.program_id(2)

    @pl.when(ki == 0)
    def _():
        m_sc[...] = jnp.full(m_sc.shape, -jnp.inf, jnp.float32)
        l_sc[...] = jnp.zeros_like(l_sc)
        acc_sc[...] = jnp.zeros_like(acc_sc)

    q = q_ref[0]                                                     # (tq, Cp) bf16 (pre-scaled)
    k = k_ref[0]                                                     # (tk, Cp) bf16
    # contract last dims of q and k (standard flash pattern, no K transpose copy)
    s = jax.lax.dot_general(q, k, (((1,), (1,)), ((), ())),
                            preferred_element_type=jnp.float32)      # (tq, tk) f32

    m_prev = m_sc[...]
    m_new = jnp.maximum(m_prev, jnp.max(s, axis=-1, keepdims=True))
    alpha = jnp.exp(m_prev - m_new)
    p = jnp.exp(s - m_new)                                           # (tq, tk) f32
    l_sc[...] = alpha * l_sc[...] + jnp.sum(p, axis=-1, keepdims=True)
    acc_sc[...] = alpha * acc_sc[...] + jnp.dot(
        p.astype(v_ref.dtype), v_ref[0], preferred_element_type=jnp.float32)
    m_sc[...] = m_new

    @pl.when(ki == pl.num_programs(2) - 1)
    def _():
        o = acc_sc[...] * pl.reciprocal(l_sc[...], approx=True)      # (tq, Cp) f32
        y = jnp.dot(o.astype(wout_ref.dtype), wout_ref[...],
                    preferred_element_type=jnp.float32) + bout_ref[...]
        # residual add in f32, cast to model dtype on store
        out_ref[0] = (y + xres_ref[0].astype(jnp.float32)).astype(out_ref.dtype)


# --------------------------------------------------------------------------------------
# Wrapper
# --------------------------------------------------------------------------------------
def self_attention_pallas(x_nchw, params, num_groups, *, matmul_dtype=jnp.bfloat16):
    b, c, h, w = x_nchw.shape
    assert c % num_groups == 0
    cg = c // num_groups
    S = h * w
    Cp = _round_up(c, 128)                      # lane-dense channel dim
    in_dtype = x_nchw.dtype
    vmem_budget = _vmem_budget_bytes()

    x_f32 = x_nchw.astype(jnp.float32)

    # ---- GroupNorm statistics in plain XLA (two scalars per (batch, group)), folded into a
    #      per-(batch, channel) affine that the Pallas kernel applies row-wise ----
    xg = x_f32.reshape(b, num_groups, cg * h * w)
    mean_g = jnp.mean(xg, axis=-1)                                   # (b, G)
    var_g = jnp.mean(jnp.square(xg - mean_g[..., None]), axis=-1)    # (b, G) biased, like torch
    inv_g = jax.lax.rsqrt(var_g + 1e-5)
    gamma = jnp.asarray(params["gn_gamma"], jnp.float32).reshape(c)
    beta = jnp.asarray(params["gn_beta"], jnp.float32).reshape(c)
    inv_c = jnp.repeat(inv_g, cg, axis=1)                            # (b, c)
    mean_c = jnp.repeat(mean_g, cg, axis=1)
    a_c = inv_c * gamma[None, :]                                     # scale
    s_c = beta[None, :] - mean_c * a_c                               # shift
    # padded channels get scale=shift=0 -> normalized value 0 -> padded matmul rows inert
    gn_scale = jnp.pad(a_c, ((0, 0), (0, Cp - c))).reshape(b, 1, Cp)
    gn_shift = jnp.pad(s_c, ((0, 0), (0, Cp - c))).reshape(b, 1, Cp)

    # ---- NCHW -> token layout [B, S, Cp], zero-padded channels ----
    x_tok = jnp.transpose(x_f32, (0, 2, 3, 1)).reshape(b, S, c)
    x_tok = jnp.pad(x_tok, ((0, 0), (0, 0), (0, Cp - c)))

    # ---- weights: fused, pre-transposed, padded; attention scale folded into q ----
    attn_scale = float(c) ** -0.5
    wqkv = jnp.asarray(params["wqkv"], jnp.float32).reshape(3 * c, c)
    bqkv = jnp.asarray(params["bqkv"], jnp.float32).reshape(3 * c)

    def prep_w(w_oc, s=1.0):                                         # (C_out, C_in) -> (Cp, Cp)
        wt = (w_oc * s).T
        return jnp.pad(wt, ((0, Cp - c), (0, Cp - c)))

    def pad_row(vec, s=1.0):
        return jnp.pad(jnp.asarray(vec, jnp.float32).reshape(-1) * s, (0, Cp - c))

    w_qkv_t = jnp.concatenate(
        [prep_w(wqkv[:c], attn_scale), prep_w(wqkv[c:2 * c]), prep_w(wqkv[2 * c:])],
        axis=1).astype(matmul_dtype)                                 # (Cp, 3*Cp)
    b_qkv = jnp.concatenate(
        [pad_row(bqkv[:c], attn_scale), pad_row(bqkv[c:2 * c]), pad_row(bqkv[2 * c:])]
    ).reshape(1, 3 * Cp)                                             # (1, 3*Cp) f32
    wout_t = prep_w(jnp.asarray(params["wout"], jnp.float32)).astype(matmul_dtype)
    bout = pad_row(params["bout"]).reshape(1, Cp)

    # ---------------- Kernel 1: normalize + fused QKV (grid over batch x S-tiles) ----------------
    tS = _pick_tile(S, (512, 256, 128, 64, 32, 16, 8))
    while tS >= 16 and S % (tS // 2) == 0 and tS * Cp * 20 > vmem_budget // 3:
        tS //= 2
    nS = S // tS

    cost1 = pl.CostEstimate(
        flops=int(b * 2 * S * Cp * 3 * Cp),
        transcendentals=0,
        bytes_accessed=int(b * S * Cp * (4 + 3 * 2) + Cp * 3 * Cp * 2),
    )

    def qkv_call(buffered):
        return pl.pallas_call(
            _norm_qkv_kernel,
            out_shape=(jax.ShapeDtypeStruct((b, S, Cp), matmul_dtype),) * 3,
            grid_spec=pltpu.PrefetchScalarGridSpec(
                num_scalar_prefetch=0,
                grid=(b, nS),
                in_specs=[
                    pl.BlockSpec((1, tS, Cp), lambda bi, si: (bi, si, 0)),   # x tokens
                    pl.BlockSpec((1, 1, Cp), lambda bi, si: (bi, 0, 0)),     # gn scale
                    pl.BlockSpec((1, 1, Cp), lambda bi, si: (bi, 0, 0)),     # gn shift
                    _wspec((Cp, 3 * Cp), lambda bi, si: (0, 0), buffered),   # fused qkv weight
                    _wspec((1, 3 * Cp), lambda bi, si: (0, 0), buffered),    # fused qkv bias
                ],
                out_specs=(
                    pl.BlockSpec((1, tS, Cp), lambda bi, si: (bi, si, 0)),
                    pl.BlockSpec((1, tS, Cp), lambda bi, si: (bi, si, 0)),
                    pl.BlockSpec((1, tS, Cp), lambda bi, si: (bi, si, 0)),
                ),
            ),
            compiler_params=pltpu.CompilerParams(
                dimension_semantics=("parallel", "parallel"),
                vmem_limit_bytes=vmem_budget),
            cost_estimate=cost1,
        )

    try:
        q, k, v = qkv_call(True)(x_tok, gn_scale, gn_shift, w_qkv_t, b_qkv)
        jax.block_until_ready((q, k, v))
    except Exception:
        # fallback: installed JAX rejects pipeline_mode=pl.Buffered(1)
        q, k, v = qkv_call(False)(x_tok, gn_scale, gn_shift, w_qkv_t, b_qkv)

    # ---------------- Kernel 2: flash attention + out proj + residual ----------------
    tq = _pick_tile(S, (512, 256, 128, 64, 32, 16, 8))
    while tq >= 16 and S % (tq // 2) == 0 and tq * Cp * 24 > vmem_budget // 3:
        tq //= 2

    # K/V residency: if one batch's double-buffered bf16 K+V plus the (tq, S) score block fit
    # well within the budget, use tk=S -> the k/v block index is constant across q tiles, so
    # K/V are fetched from HBM once per batch instead of once per q tile.
    if 2 * (2 * S * Cp * 2) + tq * S * 4 <= vmem_budget // 2:
        tk = S
    else:
        tk = _pick_tile(S, (256, 128, 64, 32, 16, 8))   # 256 first: fills v6e/v7x 256-wide MXU
    nq, nk = S // tq, S // tk

    out_bytes = jnp.dtype(in_dtype).itemsize
    cost2 = pl.CostEstimate(
        flops=int(b * (4 * S * S * Cp + 2 * S * Cp * Cp)),
        transcendentals=int(b * S * S),
        bytes_accessed=int(b * S * Cp * (3 * 2 + 4 + out_bytes) + Cp * Cp * 2),
    )

    def attn_call(buffered):
        return pl.pallas_call(
            _flash_attn_out_kernel,
            out_shape=jax.ShapeDtypeStruct((b, S, Cp), in_dtype),
            grid_spec=pltpu.PrefetchScalarGridSpec(
                num_scalar_prefetch=0,
                grid=(b, nq, nk),
                in_specs=[
                    pl.BlockSpec((1, tq, Cp), lambda bi, qi, ki: (bi, qi, 0)),  # q
                    pl.BlockSpec((1, tk, Cp), lambda bi, qi, ki: (bi, ki, 0)),  # k
                    pl.BlockSpec((1, tk, Cp), lambda bi, qi, ki: (bi, ki, 0)),  # v
                    pl.BlockSpec((1, tq, Cp), lambda bi, qi, ki: (bi, qi, 0)),  # residual x
                    _wspec((Cp, Cp), lambda bi, qi, ki: (0, 0), buffered),      # wout_t
                    _wspec((1, Cp), lambda bi, qi, ki: (0, 0), buffered),       # bout
                ],
                out_specs=pl.BlockSpec((1, tq, Cp), lambda bi, qi, ki: (bi, qi, 0)),
                scratch_shapes=[
                    pltpu.VMEM((tq, 1), jnp.float32),      # running max
                    pltpu.VMEM((tq, 1), jnp.float32),      # running softmax denominator
                    pltpu.VMEM((tq, Cp), jnp.float32),     # f32 output accumulator
                ],
            ),
            compiler_params=pltpu.CompilerParams(
                dimension_semantics=("parallel", "parallel", "arbitrary"),
                vmem_limit_bytes=vmem_budget),
            cost_estimate=cost2,
        )

    try:
        out_tok = attn_call(True)(q, k, v, x_tok, wout_t, bout)
        jax.block_until_ready(out_tok)
    except Exception:
        out_tok = attn_call(False)(q, k, v, x_tok, wout_t, bout)

    # token layout -> NCHW, drop channel padding
    out = out_tok[:, :, :c].reshape(b, h, w, c)
    return jnp.transpose(out, (0, 3, 1, 2)).astype(in_dtype)


# --------------------------------------------------------------------------------------
# Pure-JAX reference (mirrors the PyTorch forward) for verification
# --------------------------------------------------------------------------------------
def self_attention_reference(x_nchw, params, num_groups):
    b, c, h, w = x_nchw.shape
    S = h * w
    cg = c // num_groups
    x = x_nchw.astype(jnp.float32)
    xg = x.reshape(b, num_groups, cg, h, w)
    mean = xg.mean(axis=(2, 3, 4), keepdims=True)
    var = xg.var(axis=(2, 3, 4), keepdims=True)
    xn = ((xg - mean) / jnp.sqrt(var + 1e-5)).reshape(b, c, h, w)
    xn = xn * params["gn_gamma"].reshape(1, c, 1, 1) + params["gn_beta"].reshape(1, c, 1, 1)
    qkv = jnp.einsum("bchw,oc->bohw", xn, params["wqkv"]) + params["bqkv"].reshape(1, 3 * c, 1, 1)
    q, k, v = qkv[:, :c], qkv[:, c:2 * c], qkv[:, 2 * c:]
    q = jnp.transpose(q, (0, 2, 3, 1)).reshape(b, S, c)
    k = k.reshape(b, c, S)
    v = jnp.transpose(v, (0, 2, 3, 1)).reshape(b, S, c)
    scores = jnp.einsum("bsc,bct->bst", q, k) * (c ** -0.5)
    attn = jax.nn.softmax(scores, axis=-1)
    o = jnp.einsum("bst,btc->bsc", attn, v)
    o = jnp.transpose(o.reshape(b, h, w, c), (0, 3, 1, 2))
    o = jnp.einsum("bchw,oc->bohw", o, params["wout"]) + params["bout"].reshape(1, c, 1, 1)
    return o + x


if __name__ == "__main__":
    B, C, H, W = 2, 4, 16, 16
    NUM_GROUPS = 2

    key = jax.random.PRNGKey(0)
    kx, k1, k2, k3, k4 = jax.random.split(key, 5)

    x = jax.random.normal(kx, (B, C, H, W), dtype=jnp.float32)

    params = {
        "gn_gamma": jnp.ones((C,), jnp.float32),
        "gn_beta": jnp.zeros((C,), jnp.float32),
        "wqkv": 0.1 * jax.random.normal(k1, (3 * C, C), dtype=jnp.float32),   # Conv2d(C, 3C, 1)
        "bqkv": 0.1 * jax.random.normal(k2, (3 * C,), dtype=jnp.float32),
        "wout": 0.1 * jax.random.normal(k3, (C, C), dtype=jnp.float32),       # Conv2d(C, C, 1)
        "bout": 0.1 * jax.random.normal(k4, (C,), dtype=jnp.float32),
    }

    out = self_attention_pallas(x, params, NUM_GROUPS)
    out = jax.block_until_ready(out)

    ref = self_attention_reference(x, params, NUM_GROUPS)
    assert out.shape == (B, C, H, W)
    # bf16 MXU operands (f32 accumulation) + approx softmax reciprocal -> relaxed tolerance
    err = float(jnp.max(jnp.abs(out - ref)))
    assert err < 2e-2, err

    print("KERNEL_OK")
</pallas_src>

<mosaic_0001>
module attributes {stable_mosaic.version = 11 : i64} {
  func.func @_norm_qkv_kernel(%arg0: i32, %arg1: i32, %arg2: memref<1x256x128xf32, #tpu.memory_space<vmem>>, %arg3: memref<1x1x128xf32, #tpu.memory_space<vmem>>, %arg4: memref<1x1x128xf32, #tpu.memory_space<vmem>>, %arg5: memref<128x384xbf16, #tpu.memory_space<vmem>>, %arg6: memref<1x384xf32, #tpu.memory_space<vmem>>, %arg7: memref<1x256x128xbf16, #tpu.memory_space<vmem>>, %arg8: memref<1x256x128xbf16, #tpu.memory_space<vmem>>, %arg9: memref<1x256x128xbf16, #tpu.memory_space<vmem>>) attributes {dimension_semantics = [#tpu.dimension_semantics<parallel>, #tpu.dimension_semantics<parallel>], iteration_bounds = array<i64: 2, 1>, scalar_prefetch = 0 : i64, scratch_operands = 0 : i64, tpu.core_type = #tpu.core_type<tc>, window_params = [{transform_indices = @transform_0, window_bounds = array<i64: 1, 256, 128>}, {transform_indices = @transform_1, window_bounds = array<i64: 1, 1, 128>}, {transform_indices = @transform_2, window_bounds = array<i64: 1, 1, 128>}, {pipeline_mode = #tpu.pipeline_mode<synchronous>, transform_indices = @transform_3, window_bounds = array<i64: 128, 384>}, {pipeline_mode = #tpu.pipeline_mode<synchronous>, transform_indices = @transform_4, window_bounds = array<i64: 1, 384>}, {transform_indices = @transform_5, window_bounds = array<i64: 1, 256, 128>}, {transform_indices = @transform_6, window_bounds = array<i64: 1, 256, 128>}, {transform_indices = @transform_7, window_bounds = array<i64: 1, 256, 128>}]} {
    %c0 = arith.constant 0 : index
    %c0_0 = arith.constant 0 : index
    %c0_1 = arith.constant 0 : index
    %0 = vector.load %arg2[%c0, %c0_0, %c0_1] : memref<1x256x128xf32, #tpu.memory_space<vmem>>, vector<1x256x128xf32>
    %1 = vector.shape_cast %0 : vector<1x256x128xf32> to vector<256x128xf32>
    %c0_2 = arith.constant 0 : index
    %c0_3 = arith.constant 0 : index
    %c0_4 = arith.constant 0 : index
    %2 = vector.load %arg3[%c0_2, %c0_3, %c0_4] : memref<1x1x128xf32, #tpu.memory_space<vmem>>, vector<1x1x128xf32>
    %3 = vector.shape_cast %2 : vector<1x1x128xf32> to vector<1x128xf32>
    %4 = vector.broadcast %3 : vector<1x128xf32> to vector<256x128xf32>
    %5 = arith.mulf %1, %4 : vector<256x128xf32>
    %c0_5 = arith.constant 0 : index
    %c0_6 = arith.constant 0 : index
    %c0_7 = arith.constant 0 : index
    %6 = vector.load %arg4[%c0_5, %c0_6, %c0_7] : memref<1x1x128xf32, #tpu.memory_space<vmem>>, vector<1x1x128xf32>
    %7 = vector.shape_cast %6 : vector<1x1x128xf32> to vector<1x128xf32>
    %8 = vector.broadcast %7 : vector<1x128xf32> to vector<256x128xf32>
    %9 = arith.addf %5, %8 : vector<256x128xf32>
    %10 = arith.truncf %9 : vector<256x128xf32> to vector<256x128xbf16>
    %c0_8 = arith.constant 0 : index
    %c0_9 = arith.constant 0 : index
    %11 = vector.load %arg5[%c0_8, %c0_9] : memref<128x384xbf16, #tpu.memory_space<vmem>>, vector<128x384xbf16>
    %cst = arith.constant dense<0.000000e+00> : vector<256x384xf32>
    %12 = tpu.matmul %10, %11, %cst {dimension_numbers = #tpu.dot_dimension_numbers<[1], [0], [0], [1], [0, 0, 1, 1], [], []>} : vector<256x128xbf16>, vector<128x384xbf16>, vector<256x384xf32> -> vector<256x384xf32>
    %c0_10 = arith.constant 0 : index
    %c0_11 = arith.constant 0 : index
    %13 = vector.load %arg6[%c0_10, %c0_11] : memref<1x384xf32, #tpu.memory_space<vmem>>, vector<1x384xf32>
    %14 = vector.broadcast %13 : vector<1x384xf32> to vector<256x384xf32>
    %15 = arith.addf %12, %14 : vector<256x384xf32>
    %16 = vector.extract_strided_slice %15 {offsets = [0, 0], sizes = [256, 128], strides = [1, 1]} : vector<256x384xf32> to vector<256x128xf32>
    %17 = arith.truncf %16 : vector<256x128xf32> to vector<256x128xbf16>
    %c0_12 = arith.constant 0 : index
    %c0_13 = arith.constant 0 : index
    %c0_14 = arith.constant 0 : index
    %18 = vector.load %arg7[%c0_12, %c0_13, %c0_14] : memref<1x256x128xbf16, #tpu.memory_space<vmem>>, vector<1x256x128xbf16>
    %19 = vector.shape_cast %18 : vector<1x256x128xbf16> to vector<256x128xbf16>
    %20 = vector.shape_cast %17 : vector<256x128xbf16> to vector<1x256x128xbf16>
    tpu.vector_store %arg7[%c0_12, %c0_13, %c0_14], %20 {strides = array<i32>} : memref<1x256x128xbf16, #tpu.memory_space<vmem>>, vector<1x256x128xbf16>,
    %21 = vector.extract_strided_slice %15 {offsets = [0, 128], sizes = [256, 128], strides = [1, 1]} : vector<256x384xf32> to vector<256x128xf32>
    %22 = arith.truncf %21 : vector<256x128xf32> to vector<256x128xbf16>
    %c0_15 = arith.constant 0 : index
    %c0_16 = arith.constant 0 : index
    %c0_17 = arith.constant 0 : index
    %23 = vector.load %arg8[%c0_15, %c0_16, %c0_17] : memref<1x256x128xbf16, #tpu.memory_space<vmem>>, vector<1x256x128xbf16>
    %24 = vector.shape_cast %23 : vector<1x256x128xbf16> to vector<256x128xbf16>
    %25 = vector.shape_cast %22 : vector<256x128xbf16> to vector<1x256x128xbf16>
    tpu.vector_store %arg8[%c0_15, %c0_16, %c0_17], %25 {strides = array<i32>} : memref<1x256x128xbf16, #tpu.memory_space<vmem>>, vector<1x256x128xbf16>,
    %26 = vector.extract_strided_slice %15 {offsets = [0, 256], sizes = [256, 128], strides = [1, 1]} : vector<256x384xf32> to vector<256x128xf32>
    %27 = arith.truncf %26 : vector<256x128xf32> to vector<256x128xbf16>
    %c0_18 = arith.constant 0 : index
    %c0_19 = arith.constant 0 : index
    %c0_20 = arith.constant 0 : index
    %28 = vector.load %arg9[%c0_18, %c0_19, %c0_20] : memref<1x256x128xbf16, #tpu.memory_space<vmem>>, vector<1x256x128xbf16>
    %29 = vector.shape_cast %28 : vector<1x256x128xbf16> to vector<256x128xbf16>
    %30 = vector.shape_cast %27 : vector<256x128xbf16> to vector<1x256x128xbf16>
    tpu.vector_store %arg9[%c0_18, %c0_19, %c0_20], %30 {strides = array<i32>} : memref<1x256x128xbf16, #tpu.memory_space<vmem>>, vector<1x256x128xbf16>,
    return
  }
  func.func @transform_0(%arg0: i32, %arg1: i32) -> (i32, i32, i32) {
    %c0_i32 = arith.constant 0 : i32
    %c0_i32_0 = arith.constant 0 : i32
    return %arg0, %arg1, %c0_i32 : i32, i32, i32
  }
  func.func @transform_1(%arg0: i32, %arg1: i32) -> (i32, i32, i32) {
    %c0_i32 = arith.constant 0 : i32
    %c0_i32_0 = arith.constant 0 : i32
    %c0_i32_1 = arith.constant 0 : i32
    return %arg0, %c0_i32, %c0_i32_0 : i32, i32, i32
  }
  func.func @transform_2(%arg0: i32, %arg1: i32) -> (i32, i32, i32) {
    %c0_i32 = arith.constant 0 : i32
    %c0_i32_0 = arith.constant 0 : i32
    %c0_i32_1 = arith.constant 0 : i32
    return %arg0, %c0_i32, %c0_i32_0 : i32, i32, i32
  }
  func.func @transform_3(%arg0: i32, %arg1: i32) -> (i32, i32) {
    %c0_i32 = arith.constant 0 : i32
    %c0_i32_0 = arith.constant 0 : i32
    %c0_i32_1 = arith.constant 0 : i32
    return %c0_i32, %c0_i32_0 : i32, i32
  }
  func.func @transform_4(%arg0: i32, %arg1: i32) -> (i32, i32) {
    %c0_i32 = arith.constant 0 : i32
    %c0_i32_0 = arith.constant 0 : i32
    %c0_i32_1 = arith.constant 0 : i32
    return %c0_i32, %c0_i32_0 : i32, i32
  }
  func.func @transform_5(%arg0: i32, %arg1: i32) -> (i32, i32, i32) {
    %c0_i32 = arith.constant 0 : i32
    %c0_i32_0 = arith.constant 0 : i32
    return %arg0, %arg1, %c0_i32 : i32, i32, i32
  }
  func.func @transform_6(%arg0: i32, %arg1: i32) -> (i32, i32, i32) {
    %c0_i32 = arith.constant 0 : i32
    %c0_i32_0 = arith.constant 0 : i32
    return %arg0, %arg1, %c0_i32 : i32, i32, i32
  }
  func.func @transform_7(%arg0: i32, %arg1: i32) -> (i32, i32, i32) {
    %c0_i32 = arith.constant 0 : i32
    %c0_i32_0 = arith.constant 0 : i32
    return %arg0, %arg1, %c0_i32 : i32, i32, i32
  }
}

module attributes {stable_mosaic.version = 11 : i64} {
  func.func @_norm_qkv_kernel(%arg0: i32, %arg1: i32, %arg2: memref<1x256x128xf32, #tpu.memory_space<vmem>>, %arg3: memref<1x1x128xf32, #tpu.memory_space<vmem>>, %arg4: memref<1x1x128xf32, #tpu.memory_space<vmem>>, %arg5: memref<128x384xbf16, #tpu.memory_space<vmem>>, %arg6: memref<1x384xf32, #tpu.memory_space<vmem>>, %arg7: memref<1x256x128xbf16, #tpu.memory_space<vmem>>, %arg8: memref<1x256x128xbf16, #tpu.memory_space<vmem>>, %arg9: memref<1x256x128xbf16, #tpu.memory_space<vmem>>) attributes {dimension_semantics = [#tpu.dimension_semantics<parallel>, #tpu.dimension_semantics<parallel>], iteration_bounds = array<i64: 2, 1>, scalar_prefetch = 0 : i64, scratch_operands = 0 : i64, tpu.core_type = #tpu.core_type<tc>, window_params = [{transform_indices = @transform_0, window_bounds = array<i64: 1, 256, 128>}, {transform_indices = @transform_1, window_bounds = array<i64: 1, 1, 128>}, {transform_indices = @transform_2, window_bounds = array<i64: 1, 1, 128>}, {pipeline_mode = #tpu.pipeline_mode<synchronous>, transform_indices = @transform_3, window_bounds = array<i64: 128, 384>}, {pipeline_mode = #tpu.pipeline_mode<synchronous>, transform_indices = @transform_4, window_bounds = array<i64: 1, 384>}, {transform_indices = @transform_5, window_bounds = array<i64: 1, 256, 128>}, {transform_indices = @transform_6, window_bounds = array<i64: 1, 256, 128>}, {transform_indices = @transform_7, window_bounds = array<i64: 1, 256, 128>}]} {
    %c0 = arith.constant 0 : index
    %c0_0 = arith.constant 0 : index
    %c0_1 = arith.constant 0 : index
    %0 = vector.load %arg2[%c0, %c0_0, %c0_1] : memref<1x256x128xf32, #tpu.memory_space<vmem>>, vector<1x256x128xf32>
    %1 = vector.shape_cast %0 : vector<1x256x128xf32> to vector<256x128xf32>
    %c0_2 = arith.constant 0 : index
    %c0_3 = arith.constant 0 : index
    %c0_4 = arith.constant 0 : index
    %2 = vector.load %arg3[%c0_2, %c0_3, %c0_4] : memref<1x1x128xf32, #tpu.memory_space<vmem>>, vector<1x1x128xf32>
    %3 = vector.shape_cast %2 : vector<1x1x128xf32> to vector<1x128xf32>
    %4 = vector.broadcast %3 : vector<1x128xf32> to vector<256x128xf32>
    %5 = arith.mulf %1, %4 : vector<256x128xf32>
    %c0_5 = arith.constant 0 : index
    %c0_6 = arith.constant 0 : index
    %c0_7 = arith.constant 0 : index
    %6 = vector.load %arg4[%c0_5, %c0_6, %c0_7] : memref<1x1x128xf32, #tpu.memory_space<vmem>>, vector<1x1x128xf32>
    %7 = vector.shape_cast %6 : vector<1x1x128xf32> to vector<1x128xf32>
    %8 = vector.broadcast %7 : vector<1x128xf32> to vector<256x128xf32>
    %9 = arith.addf %5, %8 : vector<256x128xf32>
    %10 = arith.truncf %9 : vector<256x128xf32> to vector<256x128xbf16>
    %c0_8 = arith.constant 0 : index
    %c0_9 = arith.constant 0 : index
    %11 = vector.load %arg5[%c0_8, %c0_9] : memref<128x384xbf16, #tpu.memory_space<vmem>>, vector<128x384xbf16>
    %cst = arith.constant dense<0.000000e+00> : vector<256x384xf32>
    %12 = tpu.matmul %10, %11, %cst {dimension_numbers = #tpu.dot_dimension_numbers<[1], [0], [0], [1], [0, 0, 1, 1], [], []>} : vector<256x128xbf16>, vector<128x384xbf16>, vector<256x384xf32> -> vector<256x384xf32>
    %c0_10 = arith.constant 0 : index
    %c0_11 = arith.constant 0 : index
    %13 = vector.load %arg6[%c0_10, %c0_11] : memref<1x384xf32, #tpu.memory_space<vmem>>, vector<1x384xf32>
    %14 = vector.broadcast %13 : vector<1x384xf32> to vector<256x384xf32>
    %15 = arith.addf %12, %14 : vector<256x384xf32>
    %16 = vector.extract_strided_slice %15 {offsets = [0, 0], sizes = [256, 128], strides = [1, 1]} : vector<256x384xf32> to vector<256x128xf32>
    %17 = arith.truncf %16 : vector<256x128xf32> to vector<256x128xbf16>
    %c0_12 = arith.constant 0 : index
    %c0_13 = arith.constant 0 : index
    %c0_14 = arith.constant 0 : index
    %18 = vector.load %arg7[%c0_12, %c0_13, %c0_14] : memref<1x256x128xbf16, #tpu.memory_space<vmem>>, vector<1x256x128xbf16>
    %19 = vector.shape_cast %18 : vector<1x256x128xbf16> to vector<256x128xbf16>
    %20 = vector.shape_cast %17 : vector<256x128xbf16> to vector<1x256x128xbf16>
    tpu.vector_store %arg7[%c0_12, %c0_13, %c0_14], %20 {strides = array<i32>} : memref<1x256x128xbf16, #tpu.memory_space<vmem>>, vector<1x256x128xbf16>,
    %21 = vector.extract_strided_slice %15 {offsets = [0, 128], sizes = [256, 128], strides = [1, 1]} : vector<256x384xf32> to vector<256x128xf32>
    %22 = arith.truncf %21 : vector<256x128xf32> to vector<256x128xbf16>
    %c0_15 = arith.constant 0 : index
    %c0_16 = arith.constant 0 : index
    %c0_17 = arith.constant 0 : index
    %23 = vector.load %arg8[%c0_15, %c0_16, %c0_17] : memref<1x256x128xbf16, #tpu.memory_space<vmem>>, vector<1x256x128xbf16>
    %24 = vector.shape_cast %23 : vector<1x256x128xbf16> to vector<256x128xbf16>
    %25 = vector.shape_cast %22 : vector<256x128xbf16> to vector<1x256x128xbf16>
    tpu.vector_store %arg8[%c0_15, %c0_16, %c0_17], %25 {strides = array<i32>} : memref<1x256x128xbf16, #tpu.memory_space<vmem>>, vector<1x256x128xbf16>,
    %26 = vector.extract_strided_slice %15 {offsets = [0, 256], sizes = [256, 128], strides = [1, 1]} : vector<256x384xf32> to vector<256x128xf32>
    %27 = arith.truncf %26 : vector<256x128xf32> to vector<256x128xbf16>
    %c0_18 = arith.constant 0 : index
    %c0_19 = arith.constant 0 : index
    %c0_20 = arith.constant 0 : index
    %28 = vector.load %arg9[%c0_18, %c0_19, %c0_20] : memref<1x256x128xbf16, #tpu.memory_space<vmem>>, vector<1x256x128xbf16>
    %29 = vector.shape_cast %28 : vector<1x256x128xbf16> to vector<256x128xbf16>
    %30 = vector.shape_cast %27 : vector<256x128xbf16> to vector<1x256x128xbf16>
    tpu.vector_store %arg9[%c0_18, %c0_19, %c0_20], %30 {strides = array<i32>} : memref<1x256x128xbf16, #tpu.memory_space<vmem>>, vector<1x256x128xbf16>,
    return
  }
  func.func @transform_0(%arg0: i32, %arg1: i32) -> (i32, i32, i32) {
    %c0_i32 = arith.constant 0 : i32
    %c0_i32_0 = arith.constant 0 : i32
    return %arg0, %arg1, %c0_i32 : i32, i32, i32
  }
  func.func @transform_1(%arg0: i32, %arg1: i32) -> (i32, i32, i32) {
    %c0_i32 = arith.constant 0 : i32
    %c0_i32_0 = arith.constant 0 : i32
    %c0_i32_1 = arith.constant 0 : i32
    return %arg0, %c0_i32, %c0_i32_0 : i32, i32, i32
  }
  func.func @transform_2(%arg0: i32, %arg1: i32) -> (i32, i32, i32) {
    %c0_i32 = arith.constant 0 : i32
    %c0_i32_0 = arith.constant 0 : i32
    %c0_i32_1 = arith.constant 0 : i32
    return %arg0, %c0_i32, %c0_i32_0 : i32, i32, i32
  }
  func.func @transform_3(%arg0: i32, %arg1: i32) -> (i32, i32) {
    %c0_i32 = arith.constant 0 : i32
    %c0_i32_0 = arith.constant 0 : i32
    %c0_i32_1 = arith.constant 0 : i32
    return %c0_i32, %c0_i32_0 : i32, i32
  }
  func.func @transform_4(%arg0: i32, %arg1: i32) -> (i32, i32) {
    %c0_i32 = arith.constant 0 : i32
    %c0_i32_0 = arith.constant 0 : i32
    %c0_i32_1 = arith.constant 0 : i32
    return %c0_i32, %c0_i32_0 : i32, i32
  }
  func.func @transform_5(%arg0: i32, %arg1: i32) -> (i32, i32, i32) {
    %c0_i32 = arith.constant 0 : i32
    %c0_i32_0 = arith.constant 0 : i32
    return %arg0, %arg1, %c0_i32 : i32, i32, i32
  }
  func.func @transform_6(%arg0: i32, %arg1: i32) -> (i32, i32, i32) {
    %c0_i32 = arith.constant 0 : i32
    %c0_i32_0 = arith.constant 0 : i32
    return %arg0, %arg1, %c0_i32 : i32, i32, i32
  }
  func.func @transform_7(%arg0: i32, %arg1: i32) -> (i32, i32, i32) {
    %c0_i32 = arith.constant 0 : i32
    %c0_i32_0 = arith.constant 0 : i32
    return %arg0, %arg1, %c0_i32 : i32, i32, i32
  }
}

</mosaic_0001>

<bundles_post_ra>
// kernel: tpu_custom_call.1
= control target key start
LH: loop header
LB: loop body
LE: loop exit
PB: predicated region body
PF: predicated region fallthrough
CT: control target
= control target key end

     0   :  { %s2920_s0 = inlined_call_operand.hbm [shape: f32[2,256,128], index: 0, kind: input, shape index: {}]   ;;  %s2921_s1 = inlined_call_operand.hbm [shape: f32[2,1,128], index: 1, kind: input, shape index: {}]   ;;  %s2922_s2 = inlined_call_operand.hbm [shape: f32[2,1,128], index: 2, kind: input, shape index: {}]   ;;  %s2923_s3 = inlined_call_operand.hbm [shape: bf16[128,384], index: 3, kind: input, shape index: {}]   ;;  %s2924_s4 = inlined_call_operand.vmem [shape: f32[1,384], index: 4, kind: input, shape index: {}]   ;;  %s2925_s5 = inlined_call_operand.hbm [shape: bf16[2,256,128], index: 5, kind: output, shape index: {0}]   ;;  %s2926_s6 = inlined_call_operand.hbm [shape: bf16[2,256,128], index: 6, kind: output, shape index: {1}]   ;;  %s2927_s7 = inlined_call_operand.hbm [shape: bf16[2,256,128], index: 7, kind: output, shape index: {2}]  }
   0x1   :  { %2938 = sst [smem:[#allocation26_spill]] %s2921_s1 }
   0x2   :  { %2939 = sst [smem:[#allocation27_spill]] %s2923_s3 }
   0x3   :  { %2940 = sst [smem:[#allocation28_spill]] %s2927_s7 }
   0x4   :  { %13 = vsyncpa [#allocation3], 0 }
   0x5   :  { %15 = vsyncpa [#allocation3 + $0x1], 0 }
   0x6   :  { %16 = vsyncpa [#allocation6], 0 }
   0x7   :  { %18 = vsyncpa [#allocation6 + $0x1], 0 }
   0x8   :  { %19 = vsyncpa [#allocation9], 0 }
   0x9   :  { %20 = vsyncpa [#allocation4], 0 }
   0xa   :  { %22 = vsyncpa [#allocation4 + $0x1], 0 }
   0xb   :  { %23 = vsyncpa [#allocation12], 0 }
   0xc   :  { %25 = vsyncpa [#allocation12 + $0x1], 0  ;;  %s2319_s24 = smov 0   ;;  %s2321_s25 = smov 0  }
   0xd   :  { %s2323_s26 = smov 0   ;;  %s2325_s27 = smov 0  }
   0xe   :  { %s2327_s28 = smov 0   ;;  %s2329_s29 = smov 0  }
   0xf LB: > { %2941 = sst [smem:[#allocation19_spill]] %s2250_s24  ;;  %s2350_s30 = sadd.s32 4294967295, %s2270_s29   ;;  %s2270_s29 = sphi %s2329_s29, %s31_s29   ;;  %s2266_s28 = sphi %s2327_s28, %s2967_s28   ;;  %s2262_s27 = sphi %s2325_s27, %s2966_s27   ;;  %s2258_s26 = sphi %s2323_s26, %s2962_s26   ;;  %s2254_s25 = sphi %s2321_s25, %s2965_s25   ;;  %s2250_s24 = sphi %s2319_s24, %s2964_s24  }
  0x10   : > { %2942 = sst [smem:[#allocation20_spill]] %s2258_s26  ;;  %s2928_s8 = sadd.s32 4294967294, %s2270_s29  }
  0x11   : > { %2943 = sst [smem:[#allocation21_spill]] %s2270_s29  ;;  %s43_s9 = sadd.s32 1, %s2266_s28 }
  0x12   : > { %s52_s10 = sadd.s32 1, %s2258_s26  ;;  %p45_p0 = scmp.ge.s32.totalorder %s43_s9, 2 }
  0x13   : > { %p59_p1 = scmp.ne.s32.totalorder %s2258_s26, %s2254_s25  ;;  %p60_p2 = scmp.eq.s32.totalorder %s2270_s29, 0 }
  0x14   : > { %p65_p3 = scmp.ne.s32.totalorder %s2254_s25, %s2250_s24  ;;  %s2969_s9 = smov (%p45_p0, %s43_s9), 0 }
  0x15   : > { %2944 = sst [smem:[#allocation22_spill]] %s2969_s9  ;;  %p61_p4 = por %p60_p2, %p59_p1 }
  0x16   : > { %p185_p5 = scmp.eq.s32.totalorder %s2350_s30, 1  ;;  %s47_s11 = ssub.s32 %s2266_s28, %s2969_s9 }
  0x17   : > { %p191_p6 = scmp.eq.s32.totalorder %s2928_s8, 1  ;;  %p50_p7 = scmp.eq.s32.totalorder %s47_s11, 0 }
  0x18   : > { %p2367_p8 = por %p185_p5, %p59_p1  ;;  %p1445_p10 = scmp.ge.s32.totalorder %s2270_s29, 2 }
  0x19   : > { %p2374_p9 = por %p191_p6, %p65_p3  ;;  %p1940_p11 = scmp.lt.s32.totalorder %s2270_s29, 2 }
  0x1a   : > { %s2945_s12 = scalar_select %p2367_p8, 1, 0 }
  0x1b   : > { %s2947_s13 = scalar_select %p2374_p9, 1, 0 }
  0x1c   : > { %2946 = sst [smem:[#allocation23_spill]] %s2945_s12  ;;  %s2384_s15 = sand.u32 1, %s2258_s26  }
  0x1d   : > { %2948 = sst [smem:[#allocation24_spill]] %s2947_s13  ;;  %s308_s16 = sand.u32 1, %s2270_s29  }
  0x1e   : > { %s2379_s14 = scalar_select %p50_p7, %s2258_s26, %s52_s10  }
  0x1f   : > { %p2387_p12 = pnand %p1940_p11, %p61_p4  ;;  %s2951_s1 = sld [smem:[#allocation26_spill]] }
  0x20   : > { %2949 = sst [smem:[#allocation25_spill]] %s2379_s14  ;;  %s311_s22 = scalar_lea.vmem [#allocation5], %s2384_s15 }
  0x21   : > { %s318_s23 = sshll.u32 %s311_s22, 4  ;;  %s2396_s10 = scalar_lea.sflag [#allocation6], %s308_s16  ;;  %s319_s23 = int_to_ptr.vmem [resolvable:$true] %s318_s23 }
  0x22   : > { %p66_p13 = scmp.eq.s32.totalorder %s2350_s30, 0  ;;  %p1443_p0 = scmp.ge.s32.totalorder %s2270_s29, 1 }
  0x23   : > { %p254_p1 = scmp.lt.s32.totalorder %s2270_s29, 3  ;;  %s2953_s3 = sld [smem:[#allocation27_spill]] }
  0x24   : > { %p2409_p2 = por %p66_p13, %p65_p3  ;;  %s2272_s16 = smov [#allocation8]  }
  0x25   : > { %s314_s20 = scalar_lea.hbm %s2951_s1, %s2266_s28  ;;  %p2416_p4 = pnand %p1443_p0, %p254_p1 }
  0x26   : > { %s316_s21 = sshll.u32 %s314_s20, 4  ;;  %s1562_s18 = sshll.u32 %s2266_s28, 8  ;;  %s317_s21 = int_to_ptr.hbm [resolvable:$true] %s316_s21 }
  0x27   : > { %1925 = dma.hbm_to_vmem [thread:$0]  (!%p2387_p12), %s317_s21, 16, %s319_s23, %s2396_s10  }
  0x28   : > { %p1915_p5 = pneg %p2416_p4  ;;  %s267_s21 = sshll.u32 %s2272_s16, 4  ;;  %s268_s21 = int_to_ptr.vmem [resolvable:$true] %s267_s21 }
  0x29   : > { %s265_s20 = sshll.u32 %s2953_s3, 4  ;;  %s1446_s23 = sshll.u32 %s2384_s15, 8  ;;  %s266_s20 = int_to_ptr.hbm [resolvable:$true] %s265_s20 }
  0x2a   : > { %p1916_p3 = pnand %p1915_p5, %p66_p13  ;;  %s2273_s19 = smov 192  }
  0x2b   : > { %s2274_s8 = smov 12   ;;  %s295_s9 = scalar_lea.hbm %s2920_s0, %s1562_s18 }
  0x2c   : > { %1918 = dma.hbm_to_vmem [thread:$0]  (!%p1916_p3), %s266_s20, 3072, %s268_s21, [#allocation9], %s2273_s19, %s2273_s19, %s2274_s8  }
  0x2d   : > { %s288_s14 = scalar_lea.vmem [#allocation2], %s1446_s23  ;;  %s296_s16 = sshll.u32 %s295_s9, 4  ;;  %s297_s16 = int_to_ptr.hbm [resolvable:$true] %s296_s16 }
  0x2e   : > { %s298_s26 = sshll.u32 %s288_s14, 4  ;;  %s285_s29 = scalar_lea.sflag [#allocation3], %s2384_s15  ;;  %s299_s26 = int_to_ptr.vmem [resolvable:$true] %s298_s26 }
  0x2f   : > { %s2275_s13 = smov 128   ;;  %s2276_s24 = smov 8  }
  0x30   : > { %1922 = dma.hbm_to_vmem [thread:$0]  (!%p2387_p12), %s297_s16, 4096, %s299_s26, %s285_s29, %s2275_s13, %s2275_s13, %s2276_s24  }
  0x31   : > { %s331_s8 = scalar_lea.hbm %s2922_s2, %s2266_s28  ;;  %s328_s20 = scalar_lea.vmem [#allocation7], %s2384_s15 }
  0x32   : > { %s335_s21 = sshll.u32 %s328_s20, 4  ;;  %s333_s1 = sshll.u32 %s331_s8, 4  ;;  %s336_s21 = int_to_ptr.vmem [resolvable:$true] %s335_s21  ;;  %s334_s1 = int_to_ptr.hbm [resolvable:$true] %s333_s1 }
  0x33   : > { %1928 = dma.hbm_to_vmem [thread:$0]  (!%p2387_p12), %s334_s1, 16, %s336_s21, %s2396_s10  }
  0x34   : > { %344 = sbr.rel (%p2416_p4) target bundleno = 447 (0x1bf), region = 40  ;;  %s2443_s3 = sand.u32 (!%p2416_p4), 1, %s2254_s25  }
  0x35   : > { %s1450_s24 = sshll.u32 (!%p2416_p4), %s2443_s3, 8  ;;  %s347_s26 = scalar_lea.sflag (!%p2416_p4), [#allocation3], %s2443_s3 }
  0x36   : > { %s2447_s7 = scalar_lea.vmem (!%p2416_p4), [#allocation2], %s1450_s24 }
  0x39   : > { %2229 = dma.done.wait (%p2409_p2), %s347_s26, 4096  }
  0x3a   : > { %2231 = vsyncadd (%p2409_p2), %s347_s26, 4294963200  ;;  %s356_s29 = sand.u32 1, %s2350_s30   ;;  %s359_s12 = scalar_lea.vmem [#allocation5], %s2443_s3 }
  0x3b   : > { %s357_s9 = scalar_lea.sflag [#allocation6], %s356_s29 }
  0x3c   : > { %2233 = dma.done.wait (%p2409_p2), %s357_s9, 32  }
  0x3d   : > { %2235 = vsyncadd (%p2409_p2), %s357_s9, 4294967264  ;;  %s368_s13 = scalar_lea.vmem [#allocation7], %s2443_s3 }
  0x3e   : > { %2237 = dma.done.wait (%p66_p13), [#allocation9], 3072  }
  0x3f   : > { %2239 = vsyncadd (%p66_p13), [#allocation9], 4294964224  ;;  %v1541_v0 = vld [vmem:[#allocation8 + $0xa8] sm:$0xf]  ;;  %v1585_v1 = vld [vmem:[#allocation8 + $0xb0] sm:$0xf0] }
  0x40   : > { %v1584_v2 = vld [vmem:[#allocation8 + $0xac] sm:$0xf]  ;;  %v1542_v3 = vor.u32 %v1585_v1, %v1541_v0  ;;  %v1543_v4 = vld [vmem:[#allocation8 + $0xb4] sm:$0xf0]  ;;  %v1549_v5 = vld [vmem:[#allocation8 + $0xb0] sm:$0xf] }
  0x41   : > { %v1586_v6 = vld [vmem:[#allocation8 + $0xb8] sm:$0xf0]  ;;  %v2466_v7 = vor.u32 %v1584_v2, %v1543_v4  ;;  %v1529_v9 = vld [vmem:[#allocation8 + $0x90] sm:$0xf]  ;;  %v1581_v11 = vld [vmem:[#allocation8 + $0x94] sm:$0xf] }
  0x42   : > { %v2468_v8 = vor.u32 %v1586_v6, %v1549_v5  ;;  %v1582_v10 = vld [vmem:[#allocation8 + $0x98] sm:$0xf0]  ;;  %715 = vmatpush.bf16.msra.mxu0 %v1542_v3  ;;  %1875 = vmatpush.bf16.msra.mxu3 %v1542_v3  ;;  %v1531_v13 = vld [vmem:[#allocation8 + $0x9c] sm:$0xf0]  ;;  %v1537_v14 = vld [vmem:[#allocation8 + $0x98] sm:$0xf] }
  0x43   : > { %v1530_v12 = vor.u32 %v1582_v10, %v1529_v9  ;;  %v1583_v15 = vld [vmem:[#allocation8 + $0xa0] sm:$0xf0]  ;;  %804 = vmatpush.bf16.msra.mxu1 %v2466_v7  ;;  %v2472_v16 = vor.u32 %v1581_v11, %v1531_v13  ;;  %v1517_v18 = vld [vmem:[#allocation8 + $0x78] sm:$0xf]  ;;  %v1578_v20 = vld [vmem:[#allocation8 + $0x7c] sm:$0xf] }
  0x44   : > { %893 = vmatpush.bf16.msra.mxu2 %v2468_v8  ;;  %v2474_v17 = vor.u32 %v1583_v15, %v1537_v14  ;;  %v1579_v19 = vld [vmem:[#allocation8 + $0x80] sm:$0xf0]  ;;  %v1519_v21 = vld [vmem:[#allocation8 + $0x84] sm:$0xf0]  ;;  %v1525_v22 = vld [vmem:[#allocation8 + $0x80] sm:$0xf] }
  0x45   : > { %v1580_v23 = vld [vmem:[#allocation8 + $0x88] sm:$0xf0]  ;;  %v1518_v24 = vor.u32 %v1579_v19, %v1517_v18  ;;  %v2478_v25 = vor.u32 %v1578_v20, %v1519_v21  ;;  %v1505_v27 = vld [vmem:[#allocation8 + $0x60] sm:$0xf]  ;;  %v1575_v29 = vld [vmem:[#allocation8 + $0x64] sm:$0xf] }
  0x46   : > { %716 = vmatpush.bf16.msra.mxu0 %v1530_v12  ;;  %1876 = vmatpush.bf16.msra.mxu3 %v1530_v12  ;;  %v2480_v26 = vor.u32 %v1580_v23, %v1525_v22  ;;  %v1576_v28 = vld [vmem:[#allocation8 + $0x68] sm:$0xf0]  ;;  %v1507_v30 = vld [vmem:[#allocation8 + $0x6c] sm:$0xf0]  ;;  %v1513_v31 = vld [vmem:[#allocation8 + $0x68] sm:$0xf] }
  0x47   : > { %805 = vmatpush.bf16.msra.mxu1 %v2472_v16  ;;  %v1577_v32 = vld [vmem:[#allocation8 + $0x70] sm:$0xf0]  ;;  %v1506_v33 = vor.u32 %v1576_v28, %v1505_v27  ;;  %v2484_v34 = vor.u32 %v1575_v29, %v1507_v30  ;;  %v1493_v36 = vld [vmem:[#allocation8 + $0x48] sm:$0xf]  ;;  %v1572_v38 = vld [vmem:[#allocation8 + $0x4c] sm:$0xf] }
  0x48   : > { %894 = vmatpush.bf16.msra.mxu2 %v2474_v17  ;;  %v2486_v35 = vor.u32 %v1577_v32, %v1513_v31  ;;  %v1573_v37 = vld [vmem:[#allocation8 + $0x50] sm:$0xf0]  ;;  %v1495_v39 = vld [vmem:[#allocation8 + $0x54] sm:$0xf0]  ;;  %v1501_v40 = vld [vmem:[#allocation8 + $0x50] sm:$0xf] }
  0x49   : > { %v1574_v41 = vld [vmem:[#allocation8 + $0x58] sm:$0xf0]  ;;  %v1494_v42 = vor.u32 %v1573_v37, %v1493_v36  ;;  %v1481_v43 = vld [vmem:[#allocation8 + $0x30] sm:$0xf]  ;;  %v2490_v45 = vor.u32 %v1572_v38, %v1495_v39  ;;  %v1569_v47 = vld [vmem:[#allocation8 + $0x34] sm:$0xf] }
  0x4a   : > { %717 = vmatpush.bf16.msra.mxu0 %v1518_v24  ;;  %1877 = vmatpush.bf16.msra.mxu3 %v1518_v24  ;;  %v1570_v44 = vld [vmem:[#allocation8 + $0x38] sm:$0xf0]  ;;  %v2492_v46 = vor.u32 %v1574_v41, %v1501_v40  ;;  %v1483_v48 = vld [vmem:[#allocation8 + $0x3c] sm:$0xf0]  ;;  %v1489_v49 = vld [vmem:[#allocation8 + $0x38] sm:$0xf] }
  0x4b   : > { %806 = vmatpush.bf16.msra.mxu1 %v2478_v25  ;;  %v1571_v50 = vld [vmem:[#allocation8 + $0x40] sm:$0xf0]  ;;  %v427_v51 = vld [vmem:[%s2447_s7] sm:$0xff]  ;;  %v1482_v53 = vor.u32 %v1570_v44, %v1481_v43  ;;  %v2504_v57 = vor.u32 %v1569_v47, %v1483_v48  ;;  %v1469_v59 = vld [vmem:[#allocation8 + $0x18] sm:$0xf]  ;;  %s2635_s17 = sshll.u32 %s2443_s3, 7 }
  0x4c   : > { %895 = vmatpush.bf16.msra.mxu2 %v2480_v26  ;;  %v2497_v52 = vld [vmem:[%s359_s12] ss:$0 sm:$0xff]  ;;  %v428_v54 = vld [vmem:[%s2447_s7 + $0x8] sm:$0xff]  ;;  %v2506_v58 = vor.u32 %v1571_v50, %v1489_v49  ;;  %v1477_v63 = vld [vmem:[#allocation8 + $0x20] sm:$0xf]  ;;  %s2648_s10 = scalar_lea.vmem [#allocation10], %s2635_s17 }
  0x4d   : > { %v451_v55 = vld [vmem:[%s2447_s7 + $0xc0] sm:$0xff]  ;;  %v452_v56 = vld [vmem:[%s2447_s7 + $0xc8] sm:$0xff]  ;;  %v1568_v0 = vld [vmem:[#allocation8 + $0x28] sm:$0xf0]  ;;  %v463_v1 = vmul.f32 %v2497_v52, %v427_v51  ;;  %v464_v2 = vmul.f32 %v2497_v52, %v428_v54  ;;  %s2652_s11 = scalar_lea.vmem [#allocation11], %s2635_s17  ;;  %s2662_s22 = scalar_lea.vmem [#allocation13], %s2635_s17 }
  0x4e   : > { %718 = vmatpush.bf16.msra.mxu0 %v1506_v33  ;;  %1878 = vmatpush.bf16.msra.mxu3 %v1506_v33  ;;  %v1567_v60 = vld [vmem:[#allocation8 + $0x20] sm:$0xf0]  ;;  %v1566_v61 = vld [vmem:[#allocation8 + $0x1c] sm:$0xf]  ;;  %v1471_v62 = vld [vmem:[#allocation8 + $0x24] sm:$0xf0]  ;;  %v487_v4 = vmul.f32 %v2497_v52, %v451_v55  ;;  %v488_v5 = vmul.f32 %v2497_v52, %v452_v56  ;;  %v2518_v10 = vor.u32 %v1568_v0, %v1477_v63 }
  0x4f   : > { %807 = vmatpush.bf16.msra.mxu1 %v2484_v34  ;;  %v2512_v3 = vld [vmem:[%s368_s13] ss:$0 sm:$0xff]  ;;  %v1470_v6 = vor.u32 %v1567_v60, %v1469_v59  ;;  %v1474_v9 = vor.u32 %v1566_v61, %v1471_v62  ;;  %v1457_v11 = vld [vmem:[#allocation8] sm:$0xf]  ;;  %v1564_v12 = vld [vmem:[#allocation8 + $0x8] sm:$0xf0] }
  0x50   : > { %896 = vmatpush.bf16.msra.mxu2 %v2486_v35  ;;  %v1563_v13 = vld [vmem:[#allocation8 + $0x4] sm:$0xf]  ;;  %v1459_v14 = vld [vmem:[#allocation8 + $0xc] sm:$0xf0]  ;;  %v1465_v15 = vld [vmem:[#allocation8 + $0x8] sm:$0xf]  ;;  %v499_v19 = vadd.f32 %v2512_v3, %v463_v1  ;;  %v500_v20 = vadd.f32 %v2512_v3, %v464_v2  ;;  %v523_v21 = vadd.f32 %v2512_v3, %v487_v4  ;;  %v524_v22 = vadd.f32 %v2512_v3, %v488_v5 }
  0x51   : > { %v1565_v18 = vld [vmem:[#allocation8 + $0x10] sm:$0xf0]  ;;  %v1458_v23 = vor.u32 %v1564_v12, %v1457_v11  ;;  %v1462_v24 = vor.u32 %v1563_v13, %v1459_v14  ;;  %v429_v30 = vld [vmem:[%s2447_s7 + $0x10] sm:$0xff]  ;;  %v432_v44 = vld [vmem:[%s2447_s7 + $0x28] sm:$0xff]  ;;  %s1587_s23 = sshll.u32 %s2262_s27, 7  ;;  %s1218_s8 = sshll.u32 %s2652_s11, 4  ;;  %s2816_s8 = int_to_ptr.vmem [resolvable:$true] %s1218_s8 }
  0x52   : > { %719 = vmatpush.bf16.msra.mxu0 %v1494_v42  ;;  %1879 = vmatpush.bf16.msra.mxu3 %v1494_v42  ;;  %v2525_v27 = vor.u32 %v1565_v18, %v1465_v15  ;;  %v531_v28 = vpack.c.bf16 %v500_v20, %v499_v19  ;;  %v2527_v29 = vpack.c.bf16 %v524_v22, %v523_v21  ;;  %v430_v31 = vld [vmem:[%s2447_s7 + $0x18] sm:$0xff]  ;;  %v453_v32 = vld [vmem:[%s2447_s7 + $0xd0] sm:$0xff]  ;;  %v455_v47 = vld [vmem:[%s2447_s7 + $0xe0] sm:$0xff]  ;;  %s1217_s16 = scalar_lea.hbm %s2926_s6, %s1587_s23  ;;  %s1198_s1 = scalar_lea.hbm %s2925_s5, %s1587_s23 }
  0x53   : > { %808 = vmatpush.bf16.msra.mxu1 %v2490_v45  ;;  %v454_v33 = vld [vmem:[%s2447_s7 + $0xd8] sm:$0xff]  ;;  %v465_v36 = vmul.f32 %v2497_v52, %v429_v30  ;;  %v466_v37 = vmul.f32 %v2497_v52, %v430_v31  ;;  %v489_v38 = vmul.f32 %v2497_v52, %v453_v32  ;;  %v456_v48 = vld [vmem:[%s2447_s7 + $0xe8] sm:$0xff]  ;;  %v491_v50 = vmul.f32 %v2497_v52, %v455_v47  ;;  %v433_v59 = vld [vmem:[%s2447_s7 + $0x30] sm:$0xff]  ;;  %s2807_s24 = sshll.u32 %s1217_s16, 4  ;;  %s1199_s27 = sshll.u32 %s2648_s10, 4  ;;  %s1221_s24 = int_to_ptr.hbm [resolvable:$true] %s2807_s24  ;;  %s2823_s27 = int_to_ptr.vmem [resolvable:$true] %s1199_s27 }
  0x54   : > { %897 = vmatpush.bf16.msra.mxu2 %v2492_v46  ;;  %v434_v60 = vld [vmem:[%s2447_s7 + $0x38] sm:$0xff]  ;;  %v457_v61 = vld [vmem:[%s2447_s7 + $0xf0] sm:$0xff]  ;;  %v469_v63 = vmul.f32 %v2497_v52, %v433_v59  ;;  %v436_v11 = vld [vmem:[%s2447_s7 + $0x48] sm:$0xff]  ;;  %s2814_s26 = sshll.u32 %s1198_s1, 4  ;;  %s2955_s12 = sld [smem:[#allocation28_spill]]  ;;  %s1202_s26 = int_to_ptr.hbm [resolvable:$true] %s2814_s26 }
  0x55   : > { %v501_v39 = vadd.f32 %v2512_v3, %v465_v36  ;;  %v502_v40 = vadd.f32 %v2512_v3, %v466_v37  ;;  %v527_v54 = vadd.f32 %v2512_v3, %v491_v50  ;;  %v458_v62 = vld [vmem:[%s2447_s7 + $0xf8] sm:$0xff]  ;;  %v470_v0 = vmul.f32 %v2497_v52, %v434_v60  ;;  %v439_v22 = vld [vmem:[%s2447_s7 + $0x60] sm:$0xff]  ;;  %v441_v32 = vld [vmem:[%s2447_s7 + $0x70] sm:$0xff]  ;;  %s1237_s17 = sshll.u32 %s2662_s22, 4  ;;  %s2834_s18 = scalar_lea.sflag [#allocation12], %s356_s29  ;;  %s1238_s17 = int_to_ptr.vmem [resolvable:$true] %s1237_s17 }
  0x56   : > { %720 = vmatpush.bf16.msra.mxu0 %v1482_v53  ;;  %1880 = vmatpush.bf16.msra.mxu3 %v1482_v53  ;;  %v493_v1 = vmul.f32 %v2497_v52, %v457_v61  ;;  %v505_v2 = vadd.f32 %v2512_v3, %v469_v63  ;;  %v438_v15 = vld [vmem:[%s2447_s7 + $0x58] sm:$0xff]  ;;  %v477_v36 = vmul.f32 %v2497_v52, %v441_v32  ;;  %v445_v50 = vld [vmem:[%s2447_s7 + $0x90] sm:$0xff]  ;;  %s2140_s16 = scalar_lea.hbm %s2926_s6, 256 }
  0x57   : > { %809 = vmatpush.bf16.msra.mxu1 %v2504_v57  ;;  %v532_v42 = vpack.c.bf16 %v502_v40, %v501_v39  ;;  %v506_v4 = vadd.f32 %v2512_v3, %v470_v0  ;;  %v443_v40 = vld [vmem:[%s2447_s7 + $0x80] sm:$0xff] }
  0x58   : > { %898 = vmatpush.bf16.msra.mxu2 %v2506_v58  ;;  %v529_v5 = vadd.f32 %v2512_v3, %v493_v1 }
  0x5a   : > { %721 = vmatpush.bf16.msra.mxu0 %v1470_v6  ;;  %1881 = vmatpush.bf16.msra.mxu3 %v1470_v6  ;;  %v534_v6 = vpack.c.bf16 %v506_v4, %v505_v2  ;;  %s1236_s13 = scalar_lea.hbm %s2955_s12, %s1587_s23  ;;  %s2134_s23 = sshra.s32 %s1221_s24, 4  ;;  %s2135_s23 = int_to_ptr.hbm [resolvable:$true] %s2134_s23 }
  0x5b   : > { %810 = vmatpush.bf16.msra.mxu1 %v1474_v9  ;;  %s2827_s15 = sshll.u32 %s1236_s13, 4  ;;  %p2141_p12 = scmp.lt.s32.totalorder %s2135_s23, %s2926_s6  ;;  %s1240_s15 = int_to_ptr.hbm [resolvable:$true] %s2827_s15 }
  0x5c   : > { %899 = vmatpush.bf16.msra.mxu2 %v2518_v10 }
  0x5e   : > { %722 = vmatpush.bf16.msra.mxu0 %v1458_v23  ;;  %1882 = vmatpush.bf16.msra.mxu3 %v1458_v23  ;;  %v440_v23 = vld [vmem:[%s2447_s7 + $0x68] sm:$0xff] }
  0x5f   : > { %811 = vmatpush.bf16.msra.mxu1 %v1462_v24 }
  0x60   : > { %900 = vmatpush.bf16.msra.mxu2 %v2525_v27 }
  0x61   : > { %723 = vmatmul.bf16.vlgmr.msra.gmra.mxu0 %v531_v28  ;;  %783 = vmatmul.bf16.vlgmr.msra.gmra.mxu3 %v2527_v29 }
  0x62   : > { %1883 = vmatpush.bf16.msrb.mxu3 %v2466_v7  ;;  %812 = vmatmul.bf16.vlgmr.msra.gmra.mxu1 %v531_v28  ;;  %v490_v7 = vmul.f32 %v2497_v52, %v454_v33  ;;  %v442_v33 = vld [vmem:[%s2447_s7 + $0x78] sm:$0xff] }
  0x63   : > { %901 = vmatmul.bf16.vlgmr.msra.gmra.mxu2 %v531_v28  ;;  %v478_v37 = vmul.f32 %v2497_v52, %v442_v33 }
  0x64   : > { %v526_v41 = vadd.f32 %v2512_v3, %v490_v7 }
  0x65   : > { %v514_v7 = vadd.f32 %v2512_v3, %v478_v37 }
  0x66   : > { %1884 = vmatpush.bf16.msrb.mxu3 %v2472_v16  ;;  %v525_v16 = vadd.f32 %v2512_v3, %v489_v38  ;;  %v513_v38 = vadd.f32 %v2512_v3, %v477_v36 }
  0x68   : > { %v2547_v43 = vpack.c.bf16 %v526_v41, %v525_v16  ;;  %v538_v39 = vpack.c.bf16 %v514_v7, %v513_v38  ;;  %v444_v16 = vld [vmem:[%s2447_s7 + $0x88] sm:$0xff]  ;;  %v479_v41 = vmul.f32 %v2497_v52, %v443_v40 }
  0x6a   : > { %1885 = vmatpush.bf16.msrb.mxu3 %v2478_v25  ;;  %v431_v25 = vld [vmem:[%s2447_s7 + $0x20] sm:$0xff] }
  0x6b   : > { %v467_v49 = vmul.f32 %v2497_v52, %v431_v25  ;;  %v515_v25 = vadd.f32 %v2512_v3, %v479_v41 }
  0x6d   : > { %v503_v51 = vadd.f32 %v2512_v3, %v467_v49 }
  0x6e   : > { %1886 = vmatpush.bf16.msrb.mxu3 %v2484_v34  ;;  %v468_v34 = vmul.f32 %v2497_v52, %v432_v44 }
  0x70   : > { %v504_v53 = vadd.f32 %v2512_v3, %v468_v34  ;;  %v579_v34 = vld [vmem:[%s2924_s4] sm:$0x7] }
  0x71   : > { %728 = vmatmul.bf16.gmra.mxu0 %v532_v42  ;;  %788 = vmatmul.bf16.gmra.mxu3 %v2547_v43  ;;  %v2645_v4 = vperm.slane %v579_v34, 2 }
  0x72   : > { %1887 = vmatpush.bf16.msrb.mxu3 %v2490_v45  ;;  %817 = vmatmul.bf16.gmra.mxu1 %v532_v42  ;;  %v492_v45 = vmul.f32 %v2497_v52, %v456_v48  ;;  %v533_v56 = vpack.c.bf16 %v504_v53, %v503_v51  ;;  %v2630_v51 = vperm.slane %v579_v34, 0  ;;  %v2632_v53 = vperm.slane %v579_v34, 1 }
  0x73   : > { %906 = vmatmul.bf16.gmra.mxu2 %v532_v42  ;;  %v480_v42 = vmul.f32 %v2497_v52, %v444_v16 }
  0x74   : > { %v528_v55 = vadd.f32 %v2512_v3, %v492_v45  ;;  %v446_v45 = vld [vmem:[%s2447_s7 + $0x98] sm:$0xff] }
  0x75   : > { %v516_v44 = vadd.f32 %v2512_v3, %v480_v42  ;;  %v482_v59 = vmul.f32 %v2497_v52, %v446_v45 }
  0x76   : > { %1888 = vmatpush.bf16.msrb.mxu3 %v2504_v57  ;;  %v2564_v57 = vpack.c.bf16 %v528_v55, %v527_v54 }
  0x77   : > { %v539_v47 = vpack.c.bf16 %v516_v44, %v515_v25  ;;  %v518_v2 = vadd.f32 %v2512_v3, %v482_v59 }
  0x7a   : > { %1889 = vmatpush.bf16.msrb.mxu3 %v1474_v9 }
  0x7e   : > { %1890 = vmatpush.bf16.msrb.mxu3 %v1462_v24  ;;  %v475_v24 = vmul.f32 %v2497_v52, %v439_v22 }
  0x80   : > { %v511_v28 = vadd.f32 %v2512_v3, %v475_v24 }
  0x81   : > { %733 = vmatmul.bf16.gmra.mxu0 %v533_v56  ;;  %793 = vmatmul.bf16.gmra.mxu3 %v2564_v57 }
  0x82   : > { %1891 = vmatpush.bf16.msra.mxu3 %v2468_v8  ;;  %822 = vmatmul.bf16.gmra.mxu1 %v533_v56  ;;  %v494_v8 = vmul.f32 %v2497_v52, %v458_v62 }
  0x83   : > { %911 = vmatmul.bf16.gmra.mxu2 %v533_v56  ;;  %v481_v56 = vmul.f32 %v2497_v52, %v445_v50 }
  0x86   : > { %1892 = vmatpush.bf16.msra.mxu3 %v2474_v17  ;;  %v530_v17 = vadd.f32 %v2512_v3, %v494_v8  ;;  %v517_v8 = vadd.f32 %v2512_v3, %v481_v56 }
  0x88   : > { %v2583_v9 = vpack.c.bf16 %v530_v17, %v529_v5 }
  0x8a   : > { %1893 = vmatpush.bf16.msra.mxu3 %v2480_v26  ;;  %v435_v26 = vld [vmem:[%s2447_s7 + $0x40] sm:$0xff] }
  0x8b   : > { %v471_v12 = vmul.f32 %v2497_v52, %v435_v26 }
  0x8d   : > { %v507_v13 = vadd.f32 %v2512_v3, %v471_v12  ;;  %v540_v12 = vpack.c.bf16 %v518_v2, %v517_v8 }
  0x8e   : > { %1894 = vmatpush.bf16.msra.mxu3 %v2486_v35  ;;  %v472_v35 = vmul.f32 %v2497_v52, %v436_v11 }
  0x91   : > { %738 = vmatmul.bf16.gmra.mxu0 %v534_v6  ;;  %798 = vmatmul.bf16.gmra.mxu3 %v2583_v9 }
  0x92   : > { %1895 = vmatpush.bf16.msra.mxu3 %v2492_v46  ;;  %827 = vmatmul.bf16.gmra.mxu1 %v534_v6  ;;  %v508_v46 = vadd.f32 %v2512_v3, %v472_v35 }
  0x93   : > { %916 = vmatmul.bf16.gmra.mxu2 %v534_v6 }
  0x94   : > { %v535_v14 = vpack.c.bf16 %v508_v46, %v507_v13 }
  0x96   : > { %1896 = vmatpush.bf16.msra.mxu3 %v2506_v58  ;;  %v437_v58 = vld [vmem:[%s2447_s7 + $0x50] sm:$0xff] }
  0x97   : > { %v473_v18 = vmul.f32 %v2497_v52, %v437_v58 }
  0x99   : > { %v509_v19 = vadd.f32 %v2512_v3, %v473_v18  ;;  %v447_v18 = vld [vmem:[%s2447_s7 + $0xa0] sm:$0xff] }
  0x9a   : > { %1897 = vmatpush.bf16.msra.mxu3 %v2518_v10  ;;  %v474_v10 = vmul.f32 %v2497_v52, %v438_v15 }
  0x9c   : > { %v510_v20 = vadd.f32 %v2512_v3, %v474_v10  ;;  %v448_v10 = vld [vmem:[%s2447_s7 + $0xa8] sm:$0xff] }
  0x9d   : > { %v484_v22 = vmul.f32 %v2497_v52, %v448_v10 }
  0x9e   : > { %1898 = vmatpush.bf16.msra.mxu3 %v2525_v27  ;;  %v536_v21 = vpack.c.bf16 %v510_v20, %v509_v19  ;;  %v476_v27 = vmul.f32 %v2497_v52, %v440_v23 }
  0x9f   : > { %v520_v33 = vadd.f32 %v2512_v3, %v484_v22 }
  0xa0   : > { %v512_v30 = vadd.f32 %v2512_v3, %v476_v27 }
  0xa1   : > { %743 = vmatmul.bf16.gmra.mxu0 %v535_v14  ;;  %872 = vmatmul.bf16.vlgmr.msrb.gmra.mxu3 %v2527_v29 }
  0xa2   : > { %832 = vmatmul.bf16.gmra.mxu1 %v535_v14  ;;  %v537_v31 = vpack.c.bf16 %v512_v30, %v511_v28 }
  0xa3   : > { %921 = vmatmul.bf16.gmra.mxu2 %v535_v14 }
  0xb1   : > { %748 = vmatmul.bf16.gmra.mxu0 %v536_v21  ;;  %877 = vmatmul.bf16.gmra.mxu3 %v2547_v43 }
  0xb2   : > { %837 = vmatmul.bf16.gmra.mxu1 %v536_v21 }
  0xb3   : > { %926 = vmatmul.bf16.gmra.mxu2 %v536_v21  ;;  %v483_v21 = vmul.f32 %v2497_v52, %v447_v18 }
  0xb5   : > { %v519_v32 = vadd.f32 %v2512_v3, %v483_v21 }
  0xb7   : > { %v541_v40 = vpack.c.bf16 %v520_v33, %v519_v32 }
  0xc1   : > { %753 = vmatmul.bf16.gmra.mxu0 %v537_v31  ;;  %882 = vmatmul.bf16.gmra.mxu3 %v2564_v57 }
  0xc2   : > { %842 = vmatmul.bf16.gmra.mxu1 %v537_v31 }
  0xc3   : > { %931 = vmatmul.bf16.gmra.mxu2 %v537_v31 }
  0xd1   : > { %758 = vmatmul.bf16.gmra.mxu0 %v538_v39  ;;  %887 = vmatmul.bf16.gmra.mxu3 %v2583_v9 }
  0xd2   : > { %847 = vmatmul.bf16.gmra.mxu1 %v538_v39 }
  0xd3   : > { %936 = vmatmul.bf16.gmra.mxu2 %v538_v39 }
  0xde   : > { %v724_v48 = vpop.f32.mrf.mxu0 }
  0xdf   : > { %v813_v49 = vpop.f32.mrf.mxu1 }
  0xe0   : > { %v814_v63 = vadd.f32 %v813_v49, %v2632_v53  ;;  %v450_v49 = vld [vmem:[%s2447_s7 + $0xb8] sm:$0xff] }
  0xe1   : > { %763 = vmatmul.bf16.gmra.mxu0 %v539_v47  ;;  %961 = vmatmul.bf16.vlgmr.msra.gmra.mxu3 %v2527_v29  ;;  %v725_v29 = vadd.f32 %v724_v48, %v2630_v51  ;;  %v449_v48 = vld [vmem:[%s2447_s7 + $0xb0] sm:$0xff] }
  0xe2   : > { %852 = vmatmul.bf16.gmra.mxu1 %v539_v47  ;;  %v485_v45 = vmul.f32 %v2497_v52, %v449_v48 }
  0xe3   : > { %941 = vmatmul.bf16.gmra.mxu2 %v539_v47 }
  0xe4   : > { %v784_v54 = vpop.f32.mrf.mxu3 }
  0xe5   : > { %v785_v6 = vadd.f32 %v784_v54, %v2630_v51  ;;  %v486_v54 = vmul.f32 %v2497_v52, %v450_v49 }
  0xe6   : > { %v902_v55 = vpop.f32.mrf.mxu2  ;;  %v726_v60 = vpop.f32.mrf.mxu0 }
  0xe7   : > { %v727_v61 = vadd.f32 %v726_v60, %v2630_v51  ;;  %v815_v62 = vpop.f32.mrf.mxu1  ;;  %v903_v35 = vadd.f32 %v902_v55, %v2645_v4 }
  0xe8   : > { %v816_v0 = vadd.f32 %v815_v62, %v2632_v53  ;;  %v521_v62 = vadd.f32 %v2512_v3, %v485_v45 }
  0xe9   : > { %v1593_v1 = vpack.c.bf16 %v727_v61, %v725_v29 }
  0xea   : > { %v1673_v5 = vpack.c.bf16 %v816_v0, %v814_v63  ;;  %v522_v63 = vadd.f32 %v2512_v3, %v486_v54 }
  0xeb   : > { %1594 = vst [vmem:[%s2648_s10] sm:$0xff] %v1593_v1  }
  0xec   : > { %1674 = vst [vmem:[%s2652_s11] sm:$0xff] %v1673_v5   ;;  %v786_v17 = vpop.f32.mrf.mxu3  ;;  %v542_v5 = vpack.c.bf16 %v522_v63, %v521_v62 }
  0xed   : > { %v787_v26 = vadd.f32 %v786_v17, %v2630_v51 }
  0xee   : > { %v904_v11 = vpop.f32.mrf.mxu2  ;;  %v729_v46 = vpop.f32.mrf.mxu0 }
  0xef   : > { %v905_v13 = vadd.f32 %v904_v11, %v2645_v4  ;;  %v1653_v14 = vpack.c.bf16 %v787_v26, %v785_v6  ;;  %v818_v58 = vpop.f32.mrf.mxu1  ;;  %v730_v24 = vadd.f32 %v729_v46, %v2630_v51 }
  0xf0   : > { %v819_v28 = vadd.f32 %v818_v58, %v2632_v53 }
  0xf1   : > { %v1753_v15 = vpack.c.bf16 %v905_v13, %v903_v35  ;;  %1841 = vst [vmem:[%s2648_s10 + $0x60] sm:$0xff] %v1653_v14   ;;  %768 = vmatmul.bf16.gmra.mxu0 %v540_v12  ;;  %966 = vmatmul.bf16.gmra.mxu3 %v2547_v43 }
  0xf2   : > { %857 = vmatmul.bf16.gmra.mxu1 %v540_v12 }
  0xf3   : > { %1754 = vst [vmem:[%s2662_s22] sm:$0xff] %v1753_v15   ;;  %946 = vmatmul.bf16.gmra.mxu2 %v540_v12 }
  0xf4   : > { %v789_v19 = vpop.f32.mrf.mxu3 }
  0xf5   : > { %v790_v38 = vadd.f32 %v789_v19, %v2630_v51 }
  0xf6   : > { %v907_v20 = vpop.f32.mrf.mxu2  ;;  %v731_v23 = vpop.f32.mrf.mxu0 }
  0xf7   : > { %v732_v43 = vadd.f32 %v731_v23, %v2630_v51  ;;  %v820_v27 = vpop.f32.mrf.mxu1  ;;  %v908_v16 = vadd.f32 %v907_v20, %v2645_v4 }
  0xf8   : > { %v821_v30 = vadd.f32 %v820_v27, %v2632_v53 }
  0xf9   : > { %v1598_v31 = vpack.c.bf16 %v732_v43, %v730_v24 }
  0xfa   : > { %v1678_v36 = vpack.c.bf16 %v821_v30, %v819_v28 }
  0xfb   : > { %1830 = vst [vmem:[%s2648_s10 + $0x8] sm:$0xff] %v1598_v31  }
  0xfc   : > { %1845 = vst [vmem:[%s2652_s11 + $0x8] sm:$0xff] %v1678_v36   ;;  %v791_v37 = vpop.f32.mrf.mxu3 }
  0xfd   : > { %v792_v7 = vadd.f32 %v791_v37, %v2630_v51 }
  0xfe   : > { %v909_v39 = vpop.f32.mrf.mxu2  ;;  %v734_v42 = vpop.f32.mrf.mxu0 }
  0xff   : > { %v910_v41 = vadd.f32 %v909_v39, %v2645_v4  ;;  %v1658_v25 = vpack.c.bf16 %v792_v7, %v790_v38  ;;  %v823_v44 = vpop.f32.mrf.mxu1  ;;  %v735_v56 = vadd.f32 %v734_v42, %v2630_v51 }
 0x101   : > { %v1758_v47 = vpack.c.bf16 %v910_v41, %v908_v16  ;;  %1842 = vst [vmem:[%s2648_s10 + $0x68] sm:$0xff] %v1658_v25   ;;  %773 = vmatmul.bf16.gmra.mxu0 %v541_v40  ;;  %971 = vmatmul.bf16.gmra.mxu3 %v2564_v57  ;;  %v824_v57 = vadd.f32 %v823_v44, %v2632_v53 }
 0x102   : > { %862 = vmatmul.bf16.gmra.mxu1 %v541_v40 }
 0x103   : > { %1860 = vst [vmem:[%s2662_s22 + $0x8] sm:$0xff] %v1758_v47   ;;  %951 = vmatmul.bf16.gmra.mxu2 %v541_v40 }
 0x104   : > { %v794_v34 = vpop.f32.mrf.mxu3 }
 0x105   : > { %v795_v1 = vadd.f32 %v794_v34, %v2630_v51 }
 0x106   : > { %v912_v50 = vpop.f32.mrf.mxu2  ;;  %v736_v55 = vpop.f32.mrf.mxu0 }
 0x107   : > { %v737_v59 = vadd.f32 %v736_v55, %v2630_v51  ;;  %v825_v60 = vpop.f32.mrf.mxu1  ;;  %v913_v17 = vadd.f32 %v912_v50, %v2645_v4 }
 0x108   : > { %v826_v29 = vadd.f32 %v825_v60, %v2632_v53 }
 0x109   : > { %v1603_v61 = vpack.c.bf16 %v737_v59, %v735_v56 }
 0x10a   : > { %v1683_v0 = vpack.c.bf16 %v826_v29, %v824_v57 }
 0x10b   : > { %1831 = vst [vmem:[%s2648_s10 + $0x10] sm:$0xff] %v1603_v61  }
 0x10c   : > { %1846 = vst [vmem:[%s2652_s11 + $0x10] sm:$0xff] %v1683_v0   ;;  %v796_v52 = vpop.f32.mrf.mxu3 }
 0x10d   : > { %v797_v8 = vadd.f32 %v796_v52, %v2630_v51 }
 0x10e   : > { %v914_v2 = vpop.f32.mrf.mxu2  ;;  %v739_v26 = vpop.f32.mrf.mxu0 }
 0x10f   : > { %v915_v6 = vadd.f32 %v914_v2, %v2645_v4  ;;  %v1663_v11 = vpack.c.bf16 %v797_v8, %v795_v1  ;;  %v828_v12 = vpop.f32.mrf.mxu1  ;;  %v740_v14 = vadd.f32 %v739_v26, %v2630_v51 }
 0x110   : > { %v829_v18 = vadd.f32 %v828_v12, %v2632_v53 }
 0x111   : > { %v1763_v35 = vpack.c.bf16 %v915_v6, %v913_v17  ;;  %1843 = vst [vmem:[%s2648_s10 + $0x70] sm:$0xff] %v1663_v11   ;;  %778 = vmatmul.bf16.gmra.mxu0 %v542_v5  ;;  %976 = vmatmul.bf16.gmra.mxu3 %v2583_v9 }
 0x112   : > { %867 = vmatmul.bf16.gmra.mxu1 %v542_v5 }
 0x113   : > { %1861 = vst [vmem:[%s2662_s22 + $0x10] sm:$0xff] %v1763_v35   ;;  %956 = vmatmul.bf16.gmra.mxu2 %v542_v5 }
 0x114   : > { %v799_v3 = vpop.f32.mrf.mxu3 }
 0x115   : > { %v800_v21 = vadd.f32 %v799_v3, %v2630_v51 }
 0x116   : > { %v917_v13 = vpop.f32.mrf.mxu2  ;;  %v741_v46 = vpop.f32.mrf.mxu0 }
 0x117   : > { %v742_v58 = vadd.f32 %v741_v46, %v2630_v51  ;;  %v830_v15 = vpop.f32.mrf.mxu1  ;;  %v918_v24 = vadd.f32 %v917_v13, %v2645_v4 }
 0x118   : > { %v831_v10 = vadd.f32 %v830_v15, %v2632_v53 }
 0x119   : > { %v1608_v19 = vpack.c.bf16 %v742_v58, %v740_v14 }
 0x11a   : > { %v1688_v20 = vpack.c.bf16 %v831_v10, %v829_v18 }
 0x11b   : > { %1832 = vst [vmem:[%s2648_s10 + $0x18] sm:$0xff] %v1608_v19  }
 0x11c   : > { %1847 = vst [vmem:[%s2652_s11 + $0x18] sm:$0xff] %v1688_v20   ;;  %v801_v9 = vpop.f32.mrf.mxu3 }
 0x11d   : > { %v802_v22 = vadd.f32 %v801_v9, %v2630_v51 }
 0x11e   : > { %v919_v23 = vpop.f32.mrf.mxu2  ;;  %v744_v27 = vpop.f32.mrf.mxu0 }
 0x11f   : > { %v920_v43 = vadd.f32 %v919_v23, %v2645_v4  ;;  %v1668_v28 = vpack.c.bf16 %v802_v22, %v800_v21  ;;  %v833_v30 = vpop.f32.mrf.mxu1  ;;  %v745_v37 = vadd.f32 %v744_v27, %v2630_v51 }
 0x120   : > { %v834_v39 = vadd.f32 %v833_v30, %v2632_v53 }
 0x121   : > { %v1768_v31 = vpack.c.bf16 %v920_v43, %v918_v24  ;;  %1844 = vst [vmem:[%s2648_s10 + $0x78] sm:$0xff] %v1668_v28  }
 0x123   : > { %1862 = vst [vmem:[%s2662_s22 + $0x18] sm:$0xff] %v1768_v31  }
 0x124   : > { %v873_v32 = vpop.f32.mrf.mxu3 }
 0x125   : > { %v874_v25 = vadd.f32 %v873_v32, %v2632_v53 }
 0x126   : > { %v922_v33 = vpop.f32.mrf.mxu2  ;;  %v746_v36 = vpop.f32.mrf.mxu0 }
 0x127   : > { %v747_v38 = vadd.f32 %v746_v36, %v2630_v51  ;;  %v835_v7 = vpop.f32.mrf.mxu1  ;;  %v923_v48 = vadd.f32 %v922_v33, %v2645_v4 }
 0x128   : > { %v836_v40 = vadd.f32 %v835_v7, %v2632_v53 }
 0x129   : > { %v1613_v16 = vpack.c.bf16 %v747_v38, %v745_v37 }
 0x12a   : > { %v1693_v41 = vpack.c.bf16 %v836_v40, %v834_v39 }
 0x12b   : > { %1833 = vst [vmem:[%s2648_s10 + $0x20] sm:$0xff] %v1613_v16  }
 0x12c   : > { %1848 = vst [vmem:[%s2652_s11 + $0x20] sm:$0xff] %v1693_v41   ;;  %v875_v42 = vpop.f32.mrf.mxu3 }
 0x12d   : > { %v876_v44 = vadd.f32 %v875_v42, %v2632_v53 }
 0x12e   : > { %v924_v47 = vpop.f32.mrf.mxu2  ;;  %v749_v34 = vpop.f32.mrf.mxu0 }
 0x12f   : > { %v925_v49 = vadd.f32 %v924_v47, %v2645_v4  ;;  %v1733_v50 = vpack.c.bf16 %v876_v44, %v874_v25  ;;  %v838_v45 = vpop.f32.mrf.mxu1  ;;  %v750_v60 = vadd.f32 %v749_v34, %v2630_v51 }
 0x130   : > { %v839_v61 = vadd.f32 %v838_v45, %v2632_v53 }
 0x131   : > { %v1773_v54 = vpack.c.bf16 %v925_v49, %v923_v48  ;;  %1856 = vst [vmem:[%s2652_s11 + $0x60] sm:$0xff] %v1733_v50  }
 0x133   : > { %1863 = vst [vmem:[%s2662_s22 + $0x20] sm:$0xff] %v1773_v54  }
 0x134   : > { %v878_v55 = vpop.f32.mrf.mxu3 }
 0x135   : > { %v879_v1 = vadd.f32 %v878_v55, %v2632_v53 }
 0x136   : > { %v927_v56 = vpop.f32.mrf.mxu2  ;;  %v751_v59 = vpop.f32.mrf.mxu0 }
 0x137   : > { %v752_v57 = vadd.f32 %v751_v59, %v2630_v51  ;;  %v840_v29 = vpop.f32.mrf.mxu1  ;;  %v928_v5 = vadd.f32 %v927_v56, %v2645_v4 }
 0x138   : > { %v841_v62 = vadd.f32 %v840_v29, %v2632_v53 }
 0x139   : > { %v1618_v63 = vpack.c.bf16 %v752_v57, %v750_v60 }
 0x13a   : > { %v1698_v0 = vpack.c.bf16 %v841_v62, %v839_v61 }
 0x13b   : > { %1834 = vst [vmem:[%s2648_s10 + $0x28] sm:$0xff] %v1618_v63  }
 0x13c   : > { %1849 = vst [vmem:[%s2652_s11 + $0x28] sm:$0xff] %v1698_v0   ;;  %v880_v52 = vpop.f32.mrf.mxu3 }
 0x13d   : > { %v881_v8 = vadd.f32 %v880_v52, %v2632_v53 }
 0x13e   : > { %v929_v2 = vpop.f32.mrf.mxu2  ;;  %v754_v6 = vpop.f32.mrf.mxu0 }
 0x13f   : > { %v930_v17 = vadd.f32 %v929_v2, %v2645_v4  ;;  %v1738_v26 = vpack.c.bf16 %v881_v8, %v879_v1  ;;  %v843_v11 = vpop.f32.mrf.mxu1  ;;  %v755_v46 = vadd.f32 %v754_v6, %v2630_v51 }
 0x140   : > { %v844_v15 = vadd.f32 %v843_v11, %v2632_v53 }
 0x141   : > { %v1778_v12 = vpack.c.bf16 %v930_v17, %v928_v5  ;;  %1857 = vst [vmem:[%s2652_s11 + $0x68] sm:$0xff] %v1738_v26  }
 0x143   : > { %1864 = vst [vmem:[%s2662_s22 + $0x28] sm:$0xff] %v1778_v12  }
 0x144   : > { %v883_v35 = vpop.f32.mrf.mxu3 }
 0x145   : > { %v884_v9 = vadd.f32 %v883_v35, %v2632_v53 }
 0x146   : > { %v932_v3 = vpop.f32.mrf.mxu2  ;;  %v756_v13 = vpop.f32.mrf.mxu0 }
 0x147   : > { %v757_v14 = vadd.f32 %v756_v13, %v2630_v51  ;;  %v845_v58 = vpop.f32.mrf.mxu1  ;;  %v933_v23 = vadd.f32 %v932_v3, %v2645_v4 }
 0x148   : > { %v846_v18 = vadd.f32 %v845_v58, %v2632_v53 }
 0x149   : > { %v1623_v10 = vpack.c.bf16 %v757_v14, %v755_v46 }
 0x14a   : > { %v1703_v19 = vpack.c.bf16 %v846_v18, %v844_v15 }
 0x14b   : > { %1835 = vst [vmem:[%s2648_s10 + $0x30] sm:$0xff] %v1623_v10  }
 0x14c   : > { %1850 = vst [vmem:[%s2652_s11 + $0x30] sm:$0xff] %v1703_v19   ;;  %v885_v20 = vpop.f32.mrf.mxu3 }
 0x14d   : > { %v886_v21 = vadd.f32 %v885_v20, %v2632_v53 }
 0x14e   : > { %v934_v22 = vpop.f32.mrf.mxu2  ;;  %v759_v43 = vpop.f32.mrf.mxu0 }
 0x14f   : > { %v935_v24 = vadd.f32 %v934_v22, %v2645_v4  ;;  %v1743_v27 = vpack.c.bf16 %v886_v21, %v884_v9  ;;  %v848_v28 = vpop.f32.mrf.mxu1  ;;  %v760_v36 = vadd.f32 %v759_v43, %v2630_v51 }
 0x150   : > { %v849_v7 = vadd.f32 %v848_v28, %v2632_v53 }
 0x151   : > { %v1783_v30 = vpack.c.bf16 %v935_v24, %v933_v23  ;;  %1858 = vst [vmem:[%s2652_s11 + $0x70] sm:$0xff] %v1743_v27  }
 0x153   : > { %1865 = vst [vmem:[%s2662_s22 + $0x30] sm:$0xff] %v1783_v30  }
 0x154   : > { %v888_v31 = vpop.f32.mrf.mxu3 }
 0x155   : > { %v889_v42 = vadd.f32 %v888_v31, %v2632_v53 }
 0x156   : > { %v937_v32 = vpop.f32.mrf.mxu2  ;;  %v761_v33 = vpop.f32.mrf.mxu0 }
 0x157   : > { %v762_v37 = vadd.f32 %v761_v33, %v2630_v51  ;;  %v850_v38 = vpop.f32.mrf.mxu1  ;;  %v938_v47 = vadd.f32 %v937_v32, %v2645_v4 }
 0x158   : > { %v851_v39 = vadd.f32 %v850_v38, %v2632_v53 }
 0x159   : > { %v1628_v40 = vpack.c.bf16 %v762_v37, %v760_v36 }
 0x15a   : > { %v1708_v16 = vpack.c.bf16 %v851_v39, %v849_v7 }
 0x15b   : > { %1836 = vst [vmem:[%s2648_s10 + $0x38] sm:$0xff] %v1628_v40  }
 0x15c   : > { %1851 = vst [vmem:[%s2652_s11 + $0x38] sm:$0xff] %v1708_v16   ;;  %v890_v41 = vpop.f32.mrf.mxu3 }
 0x15d   : > { %v891_v25 = vadd.f32 %v890_v41, %v2632_v53 }
 0x15e   : > { %v939_v44 = vpop.f32.mrf.mxu2  ;;  %v764_v49 = vpop.f32.mrf.mxu0 }
 0x15f   : > { %v940_v48 = vadd.f32 %v939_v44, %v2645_v4  ;;  %v1748_v34 = vpack.c.bf16 %v891_v25, %v889_v42  ;;  %v853_v50 = vpop.f32.mrf.mxu1  ;;  %v765_v59 = vadd.f32 %v764_v49, %v2630_v51 }
 0x160   : > { %v854_v29 = vadd.f32 %v853_v50, %v2632_v53 }
 0x161   : > { %v1788_v45 = vpack.c.bf16 %v940_v48, %v938_v47  ;;  %1859 = vst [vmem:[%s2652_s11 + $0x78] sm:$0xff] %v1748_v34  }
 0x163   : > { %1866 = vst [vmem:[%s2662_s22 + $0x38] sm:$0xff] %v1788_v45  }
 0x164   : > { %v962_v54 = vpop.f32.mrf.mxu3 }
 0x165   : > { %v963_v52 = vadd.f32 %v962_v54, %v2645_v4 }
 0x166   : > { %v942_v55 = vpop.f32.mrf.mxu2  ;;  %v766_v56 = vpop.f32.mrf.mxu0 }
 0x167   : > { %v767_v60 = vadd.f32 %v766_v56, %v2630_v51  ;;  %v855_v57 = vpop.f32.mrf.mxu1  ;;  %v943_v2 = vadd.f32 %v942_v55, %v2645_v4 }
 0x168   : > { %v856_v61 = vadd.f32 %v855_v57, %v2632_v53 }
 0x169   : > { %v1633_v62 = vpack.c.bf16 %v767_v60, %v765_v59 }
 0x16a   : > { %v1713_v63 = vpack.c.bf16 %v856_v61, %v854_v29 }
 0x16b   : > { %1837 = vst [vmem:[%s2648_s10 + $0x40] sm:$0xff] %v1633_v62  }
 0x16c   : > { %1852 = vst [vmem:[%s2652_s11 + $0x40] sm:$0xff] %v1713_v63   ;;  %v964_v0 = vpop.f32.mrf.mxu3 }
 0x16d   : > { %v965_v8 = vadd.f32 %v964_v0, %v2645_v4 }
 0x16e   : > { %v944_v1 = vpop.f32.mrf.mxu2  ;;  %v769_v17 = vpop.f32.mrf.mxu0 }
 0x16f   : > { %v945_v5 = vadd.f32 %v944_v1, %v2645_v4  ;;  %v1813_v6 = vpack.c.bf16 %v965_v8, %v963_v52  ;;  %v858_v26 = vpop.f32.mrf.mxu1  ;;  %v770_v13 = vadd.f32 %v769_v17, %v2630_v51 }
 0x170   : > { %v859_v58 = vadd.f32 %v858_v26, %v2632_v53 }
 0x171   : > { %v1793_v11 = vpack.c.bf16 %v945_v5, %v943_v2  ;;  %1871 = vst [vmem:[%s2662_s22 + $0x60] sm:$0xff] %v1813_v6  }
 0x173   : > { %1867 = vst [vmem:[%s2662_s22 + $0x40] sm:$0xff] %v1793_v11  }
 0x174   : > { %v967_v12 = vpop.f32.mrf.mxu3 }
 0x175   : > { %v968_v20 = vadd.f32 %v967_v12, %v2645_v4 }
 0x176   : > { %v947_v35 = vpop.f32.mrf.mxu2  ;;  %v771_v3 = vpop.f32.mrf.mxu0 }
 0x177   : > { %v772_v46 = vadd.f32 %v771_v3, %v2630_v51  ;;  %v860_v14 = vpop.f32.mrf.mxu1  ;;  %v948_v22 = vadd.f32 %v947_v35, %v2645_v4 }
 0x178   : > { %v861_v15 = vadd.f32 %v860_v14, %v2632_v53 }
 0x179   : > { %v1638_v18 = vpack.c.bf16 %v772_v46, %v770_v13 }
 0x17a   : > { %v1718_v10 = vpack.c.bf16 %v861_v15, %v859_v58 }
 0x17b   : > { %1838 = vst [vmem:[%s2648_s10 + $0x48] sm:$0xff] %v1638_v18  }
 0x17c   : > { %1853 = vst [vmem:[%s2652_s11 + $0x48] sm:$0xff] %v1718_v10   ;;  %v969_v19 = vpop.f32.mrf.mxu3 }
 0x17d   : > { %v970_v21 = vadd.f32 %v969_v19, %v2645_v4 }
 0x17e   : > { %v949_v9 = vpop.f32.mrf.mxu2  ;;  %v774_v24 = vpop.f32.mrf.mxu0 }
 0x17f   : > { %v950_v23 = vadd.f32 %v949_v9, %v2645_v4  ;;  %v1818_v43 = vpack.c.bf16 %v970_v21, %v968_v20  ;;  %v863_v27 = vpop.f32.mrf.mxu1  ;;  %v775_v33 = vadd.f32 %v774_v24, %v2630_v51 }
 0x180   : > { %v864_v38 = vadd.f32 %v863_v27, %v2632_v53 }
 0x181   : > { %v1798_v28 = vpack.c.bf16 %v950_v23, %v948_v22  ;;  %1872 = vst [vmem:[%s2662_s22 + $0x68] sm:$0xff] %v1818_v43  }
 0x183   : > { %1868 = vst [vmem:[%s2662_s22 + $0x48] sm:$0xff] %v1798_v28  }
 0x184   : > { %v972_v30 = vpop.f32.mrf.mxu3 }
 0x185   : > { %v973_v41 = vadd.f32 %v972_v30, %v2645_v4 }
 0x186   : > { %v952_v31 = vpop.f32.mrf.mxu2  ;;  %v776_v32 = vpop.f32.mrf.mxu0 }
 0x187   : > { %v777_v36 = vadd.f32 %v776_v32, %v2630_v51  ;;  %v865_v37 = vpop.f32.mrf.mxu1  ;;  %v953_v44 = vadd.f32 %v952_v31, %v2645_v4 }
 0x188   : > { %v866_v7 = vadd.f32 %v865_v37, %v2632_v53 }
 0x189   : > { %v1643_v39 = vpack.c.bf16 %v777_v36, %v775_v33 }
 0x18a   : > { %v1723_v40 = vpack.c.bf16 %v866_v7, %v864_v38 }
 0x18b   : > { %1839 = vst [vmem:[%s2648_s10 + $0x50] sm:$0xff] %v1643_v39  }
 0x18c   : > { %1854 = vst [vmem:[%s2652_s11 + $0x50] sm:$0xff] %v1723_v40   ;;  %v974_v16 = vpop.f32.mrf.mxu3 }
 0x18d   : > { %v975_v25 = vadd.f32 %v974_v16, %v2645_v4 }
 0x18e   : > { %v954_v42 = vpop.f32.mrf.mxu2  ;;  %v779_v48 = vpop.f32.mrf.mxu0 }
 0x18f   : > { %v955_v47 = vadd.f32 %v954_v42, %v2645_v4  ;;  %v1823_v49 = vpack.c.bf16 %v975_v25, %v973_v41  ;;  %v868_v34 = vpop.f32.mrf.mxu1  ;;  %v780_v56 = vadd.f32 %v779_v48, %v2630_v51 }
 0x190   : > { %v869_v57 = vadd.f32 %v868_v34, %v2632_v53 }
 0x191   : > { %v1803_v50 = vpack.c.bf16 %v955_v47, %v953_v44  ;;  %1873 = vst [vmem:[%s2662_s22 + $0x70] sm:$0xff] %v1823_v49  }
 0x193   : > { %1869 = vst [vmem:[%s2662_s22 + $0x50] sm:$0xff] %v1803_v50  }
 0x194   : > { %v977_v45 = vpop.f32.mrf.mxu3 }
 0x195   : > { %v978_v62 = vadd.f32 %v977_v45, %v2645_v4 }
 0x196   : > { %v957_v54 = vpop.f32.mrf.mxu2  ;;  %v781_v55 = vpop.f32.mrf.mxu0 }
 0x197   : > { %v782_v59 = vadd.f32 %v781_v55, %v2630_v51  ;;  %v870_v60 = vpop.f32.mrf.mxu1 }
 0x198   : > { %v871_v29 = vadd.f32 %v870_v60, %v2632_v53 }
 0x199   : > { %v1648_v61 = vpack.c.bf16 %v782_v59, %v780_v56 }
 0x19a   : > { %v1728_v51 = vpack.c.bf16 %v871_v29, %v869_v57 }
 0x19b   : > { %1840 = vst [vmem:[%s2648_s10 + $0x58] sm:$0xff] %v1648_v61   ;;  %s2136_s10 = scalar_lea.hbm %s2135_s23, 128 }
 0x19c   : > { %1855 = vst [vmem:[%s2652_s11 + $0x58] sm:$0xff] %v1728_v51   ;;  %v979_v53 = vpop.f32.mrf.mxu3  ;;  %p2137_p6 = scmp.ne.s32.totalorder %s2135_s23, %s2136_s10  ;;  %p2142_p13 = scmp.lt.s32.totalorder %s2140_s16, %s2136_s10 }
 0x19d   : > { %v980_v0 = vadd.f32 %v979_v53, %v2645_v4 }
 0x19e   : > { %v959_v63 = vpop.f32.mrf.mxu2  ;;  %p2138_p7 = pnand %p2137_p6, %p2367_p8  ;;  %p2143_p0 = por %p2142_p13, %p2141_p12 }
 0x1a0   : > { %p2139_p11 = pneg %p2138_p7 }
 0x1a2   : > { %p2144_p1 = pnand %p2143_p0, %p2139_p11 }
 0x1a4   : > { %2147 = shalt.err (!%p2144_p1)
}
 0x1a5   : > { %s2277_s30 = smov 64   ;;  %s2278_s29 = smov 4   ;;  %v958_v52 = vadd.f32 %v957_v54, %v2645_v4  ;;  %v960_v1 = vadd.f32 %v959_v63, %v2645_v4 }
 0x1a6   : > { %1910 = dma.vmem_to_hbm [thread:$0]  (%p2367_p8), %s2816_s8, 2048, %s1221_s24, %s2834_s18, %s2277_s30, %s2277_s30, %s2278_s29  }
 0x1a7   : > { %s1175_s1 = scalar_lea.sflag [#allocation4], %s2443_s3  ;;  %s2162_s7 = sshra.s32 %s1202_s26, 4  ;;  %s2163_s7 = int_to_ptr.hbm [resolvable:$true] %s2162_s7 }
 0x1a8   : > { %s2164_s9 = scalar_lea.hbm %s2163_s7, 128  ;;  %s2168_s10 = scalar_lea.hbm %s2925_s5, 256 }
 0x1a9   : > { %p2165_p2 = scmp.ne.s32.totalorder %s2163_s7, %s2164_s9  ;;  %p2169_p3 = scmp.lt.s32.totalorder %s2163_s7, %s2925_s5 }
 0x1aa   : > { %p2170_p6 = scmp.lt.s32.totalorder %s2168_s10, %s2164_s9 }
 0x1ab   : > { %p2166_p4 = pnand %p2165_p2, %p2367_p8 }
 0x1ac   : > { %p2171_p7 = por %p2170_p6, %p2169_p3 }
 0x1ad   : > { %p2167_p5 = pneg %p2166_p4 }
 0x1af   : > { %p2172_p11 = pnand %p2171_p7, %p2167_p5 }
 0x1b1   : > { %2175 = shalt.err (!%p2172_p11)
}
 0x1b2   : > { %1909 = dma.vmem_to_hbm [thread:$0]  (%p2367_p8), %s2823_s27, 2048, %s1202_s26, %s1175_s1, %s2277_s30, %s2277_s30, %s2278_s29   ;;  %v1828_v4 = vpack.c.bf16 %v980_v0, %v978_v62  ;;  %v1808_v8 = vpack.c.bf16 %v960_v1, %v958_v52 }
 0x1b3   : > { %s2190_s3 = sshra.s32 %s1240_s15, 4  ;;  %s2196_s20 = scalar_lea.hbm %s2955_s12, 256  ;;  %s2191_s3 = int_to_ptr.hbm [resolvable:$true] %s2190_s3 }
 0x1b4   : > { %1874 = vst [vmem:[%s2662_s22 + $0x78] sm:$0xff] %v1828_v4   ;;  %s2192_s8 = scalar_lea.hbm %s2191_s3, 128  ;;  %p2197_p1 = scmp.lt.s32.totalorder %s2191_s3, %s2955_s12 }
 0x1b5   : > { %1870 = vst [vmem:[%s2662_s22 + $0x58] sm:$0xff] %v1808_v8   ;;  %p2193_p12 = scmp.ne.s32.totalorder %s2191_s3, %s2192_s8  ;;  %p2198_p2 = scmp.lt.s32.totalorder %s2196_s20, %s2192_s8 }
 0x1b7   : > { %p2194_p13 = pnand %p2193_p12, %p2367_p8  ;;  %p2199_p4 = por %p2198_p2, %p2197_p1 }
 0x1b9   : > { %p2195_p0 = pneg %p2194_p13 }
 0x1bb   : > { %p2200_p5 = pnand %p2199_p4, %p2195_p0 }
 0x1bd   : > { %2203 = shalt.err (!%p2200_p5)
}
 0x1be   : > { %1911 = dma.vmem_to_hbm [thread:$0]  (%p2367_p8), %s1238_s17, 2048, %s1240_s15, %s2834_s18, %s2277_s30, %s2277_s30, %s2278_s29  }
 0x1bf PF: > { %s2957_s22 = sld [smem:[#allocation19_spill]]  ;;  %p1930_p3 = pnand %p1445_p10, %p2374_p9 }
 0x1c0   : > { %s2959_s1 = sld [smem:[#allocation21_spill]] }
 0x1c1   : > { %p1931_p6 = pneg %p1930_p3 }
 0x1c5   : > { %s1254_s7 = sand.u32 1, %s2957_s22  }
 0x1c6   : > { %s1255_s9 = scalar_lea.sflag [#allocation4], %s1254_s7 }
 0x1c7   : > { %2241 = dma.done.wait (%p1931_p6), %s1255_s9, 2048  }
 0x1c8   : > { %2243 = vsyncadd (%p1931_p6), %s1255_s9, 4294965248  ;;  %s2960_s13 = sadd.s32 4294967294, %s2959_s1  }
 0x1c9   : > { %s1264_s14 = sand.u32 1, %s2960_s13  }
 0x1ca   : > { %s1265_s23 = scalar_lea.sflag [#allocation12], %s1264_s14 }
 0x1cb   : > { %2245 = dma.done.wait (%p1931_p6), %s1265_s23, 4096  }
 0x1cc   : > { %2247 = vsyncadd (%p1931_p6), %s1265_s23, 4294963200  ;;  %s31_s29 = sadd.s32 1, %s2959_s1   ;;  %s2961_s15 = sld [smem:[#allocation20_spill]] }
 0x1cd   : > { %p28_p8 = scmp.ge.s32.totalorder %s31_s29, 4   ;;  %s2962_s26 = sld [smem:[#allocation25_spill]] }
 0x1ce   : > { %s2963_s17 = sld [smem:[#allocation22_spill]]  ;;  %s2964_s24 = smov %s2254_s25 }
 0x1cf   : > { %s2966_s27 = smov %s2266_s28 }
 0x1d0   :  { %30 = sbr.rel (!%p28_p8) target bundleno = 15 (0xf), region = 145 }
 0x1d2   : > { %s2965_s25 = smov %s2961_s15 }
 0x1d4   : > { %s2967_s28 = smov %s2963_s17 }
 0x1d5   :  { %1281 = vsyncpa [#allocation3], 1 }
 0x1d6   :  { %1283 = vsyncpa [#allocation3 + $0x1], 1 }
 0x1d7   :  { %1284 = vsyncpa [#allocation6], 1 }
 0x1d8   :  { %1286 = vsyncpa [#allocation6 + $0x1], 1 }
 0x1d9   :  { %1287 = vsyncpa [#allocation9], 1 }
 0x1da   :  { %1288 = vsyncpa [#allocation4], 1 }
 0x1db   :  { %1290 = vsyncpa [#allocation4 + $0x1], 1 }
 0x1dc   :  { %1291 = vsyncpa [#allocation12], 1 }
 0x1dd   :  { %1293 = vsyncpa [#allocation12 + $0x1], 1 }

// kernel: tpu_custom_call.1
= control target key start
LH: loop header
LB: loop body
LE: loop exit
PB: predicated region body
PF: predicated region fallthrough
CT: control target
= control target key end

     0   :  { %s2920_s0 = inlined_call_operand.hbm [shape: f32[2,256,128], index: 0, kind: input, shape index: {}]   ;;  %s2921_s1 = inlined_call_operand.hbm [shape: f32[2,1,128], index: 1, kind: input, shape index: {}]   ;;  %s2922_s2 = inlined_call_operand.hbm [shape: f32[2,1,128], index: 2, kind: input, shape index: {}]   ;;  %s2923_s3 = inlined_call_operand.hbm [shape: bf16[128,384], index: 3, kind: input, shape index: {}]   ;;  %s2924_s4 = inlined_call_operand.vmem [shape: f32[1,384], index: 4, kind: input, shape index: {}]   ;;  %s2925_s5 = inlined_call_operand.hbm [shape: bf16[2,256,128], index: 5, kind: output, shape index: {0}]   ;;  %s2926_s6 = inlined_call_operand.hbm [shape: bf16[2,256,128], index: 6, kind: output, shape index: {1}]   ;;  %s2927_s7 = inlined_call_operand.hbm [shape: bf16[2,256,128], index: 7, kind: output, shape index: {2}]  }
   0x1   :  { %2938 = sst [smem:[#allocation26_spill]] %s2921_s1 }
   0x2   :  { %2939 = sst [smem:[#allocation27_spill]] %s2923_s3 }
   0x3   :  { %2940 = sst [smem:[#allocation28_spill]] %s2927_s7 }
   0x4   :  { %13 = vsyncpa [#allocation3], 0 }
   0x5   :  { %15 = vsyncpa [#allocation3 + $0x1], 0 }
   0x6   :  { %16 = vsyncpa [#allocation6], 0 }
   0x7   :  { %18 = vsyncpa [#allocation6 + $0x1], 0 }
   0x8   :  { %19 = vsyncpa [#allocation9], 0 }
   0x9   :  { %20 = vsyncpa [#allocation4], 0 }
   0xa   :  { %22 = vsyncpa [#allocation4 + $0x1], 0 }
   0xb   :  { %23 = vsyncpa [#allocation12], 0 }
   0xc   :  { %25 = vsyncpa [#allocation12 + $0x1], 0  ;;  %s2319_s24 = smov 0   ;;  %s2321_s25 = smov 0  }
   0xd   :  { %s2323_s26 = smov 0   ;;  %s2325_s27 = smov 0  }
   0xe   :  { %s2327_s28 = smov 0   ;;  %s2329_s29 = smov 0  }
   0xf LB: > { %2941 = sst [smem:[#allocation19_spill]] %s2250_s24  ;;  %s2350_s30 = sadd.s32 4294967295, %s2270_s29   ;;  %s2270_s29 = sphi %s2329_s29, %s31_s29   ;;  %s2266_s28 = sphi %s2327_s28, %s2967_s28   ;;  %s2262_s27 = sphi %s2325_s27, %s2966_s27   ;;  %s2258_s26 = sphi %s2323_s26, %s2962_s26   ;;  %s2254_s25 = sphi %s2321_s25, %s2965_s25   ;;  %s2250_s24 = sphi %s2319_s24, %s2964_s24  }
  0x10   : > { %2942 = sst [smem:[#allocation20_spill]] %s2258_s26  ;;  %s2928_s8 = sadd.s32 4294967294, %s2270_s29  }
  0x11   : > { %2943 = sst [smem:[#allocation21_spill]] %s2270_s29  ;;  %s43_s9 = sadd.s32 1, %s2266_s28 }
  0x12   : > { %s52_s10 = sadd.s32 1, %s2258_s26  ;;  %p45_p0 = scmp.ge.s32.totalorder %s43_s9, 2 }
  0x13   : > { %p59_p1 = scmp.ne.s32.totalorder %s2258_s26, %s2254_s25  ;;  %p60_p2 = scmp.eq.s32.totalorder %s2270_s29, 0 }
  0x14   : > { %p65_p3 = scmp.ne.s32.totalorder %s2254_s25, %s2250_s24  ;;  %s2969_s9 = smov (%p45_p0, %s43_s9), 0 }
  0x15   : > { %2944 = sst [smem:[#allocation22_spill]] %s2969_s9  ;;  %p61_p4 = por %p60_p2, %p59_p1 }
  0x16   : > { %p185_p5 = scmp.eq.s32.totalorder %s2350_s30, 1  ;;  %s47_s11 = ssub.s32 %s2266_s28, %s2969_s9 }
  0x17   : > { %p191_p6 = scmp.eq.s32.totalorder %s2928_s8, 1  ;;  %p50_p7 = scmp.eq.s32.totalorder %s47_s11, 0 }
  0x18   : > { %p2367_p8 = por %p185_p5, %p59_p1  ;;  %p1445_p10 = scmp.ge.s32.totalorder %s2270_s29, 2 }
  0x19   : > { %p2374_p9 = por %p191_p6, %p65_p3  ;;  %p1940_p11 = scmp.lt.s32.totalorder %s2270_s29, 2 }
  0x1a   : > { %s2945_s12 = scalar_select %p2367_p8, 1, 0 }
  0x1b   : > { %s2947_s13 = scalar_select %p2374_p9, 1, 0 }
  0x1c   : > { %2946 = sst [smem:[#allocation23_spill]] %s2945_s12  ;;  %s2384_s15 = sand.u32 1, %s2258_s26  }
  0x1d   : > { %2948 = sst [smem:[#allocation24_spill]] %s2947_s13  ;;  %s308_s16 = sand.u32 1, %s2270_s29  }
  0x1e   : > { %s2379_s14 = scalar_select %p50_p7, %s2258_s26, %s52_s10  }
  0x1f   : > { %p2387_p12 = pnand %p1940_p11, %p61_p4  ;;  %s2951_s1 = sld [smem:[#allocation26_spill]] }
  0x20   : > { %2949 = sst [smem:[#allocation25_spill]] %s2379_s14  ;;  %s311_s22 = scalar_lea.vmem [#allocation5], %s2384_s15 }
  0x21   : > { %s318_s23 = sshll.u32 %s311_s22, 4  ;;  %s2396_s10 = scalar_lea.sflag [#allocation6], %s308_s16  ;;  %s319_s23 = int_to_ptr.vmem [resolvable:$true] %s318_s23 }
  0x22   : > { %p66_p13 = scmp.eq.s32.totalorder %s2350_s30, 0  ;;  %p1443_p0 = scmp.ge.s32.totalorder %s2270_s29, 1 }
  0x23   : > { %p254_p1 = scmp.lt.s32.totalorder %s2270_s29, 3  ;;  %s2953_s3 = sld [smem:[#allocation27_spill]] }
  0x24   : > { %p2409_p2 = por %p66_p13, %p65_p3  ;;  %s2272_s16 = smov [#allocation8]  }
  0x25   : > { %s314_s20 = scalar_lea.hbm %s2951_s1, %s2266_s28  ;;  %p2416_p4 = pnand %p1443_p0, %p254_p1 }
  0x26   : > { %s316_s21 = sshll.u32 %s314_s20, 4  ;;  %s1562_s18 = sshll.u32 %s2266_s28, 8  ;;  %s317_s21 = int_to_ptr.hbm [resolvable:$true] %s316_s21 }
  0x27   : > { %1925 = dma.hbm_to_vmem [thread:$0]  (!%p2387_p12), %s317_s21, 16, %s319_s23, %s2396_s10  }
  0x28   : > { %p1915_p5 = pneg %p2416_p4  ;;  %s267_s21 = sshll.u32 %s2272_s16, 4  ;;  %s268_s21 = int_to_ptr.vmem [resolvable:$true] %s267_s21 }
  0x29   : > { %s265_s20 = sshll.u32 %s2953_s3, 4  ;;  %s1446_s23 = sshll.u32 %s2384_s15, 8  ;;  %s266_s20 = int_to_ptr.hbm [resolvable:$true] %s265_s20 }
  0x2a   : > { %p1916_p3 = pnand %p1915_p5, %p66_p13  ;;  %s2273_s19 = smov 192  }
  0x2b   : > { %s2274_s8 = smov 12   ;;  %s295_s9 = scalar_lea.hbm %s2920_s0, %s1562_s18 }
  0x2c   : > { %1918 = dma.hbm_to_vmem [thread:$0]  (!%p1916_p3), %s266_s20, 3072, %s268_s21, [#allocation9], %s2273_s19, %s2273_s19, %s2274_s8  }
  0x2d   : > { %s288_s14 = scalar_lea.vmem [#allocation2], %s1446_s23  ;;  %s296_s16 = sshll.u32 %s295_s9, 4  ;;  %s297_s16 = int_to_ptr.hbm [resolvable:$true] %s296_s16 }
  0x2e   : > { %s298_s26 = sshll.u32 %s288_s14, 4  ;;  %s285_s29 = scalar_lea.sflag [#allocation3], %s2384_s15  ;;  %s299_s26 = int_to_ptr.vmem [resolvable:$true] %s298_s26 }
  0x2f   : > { %s2275_s13 = smov 128   ;;  %s2276_s24 = smov 8  }
  0x30   : > { %1922 = dma.hbm_to_vmem [thread:$0]  (!%p2387_p12), %s297_s16, 4096, %s299_s26, %s285_s29, %s2275_s13, %s2275_s13, %s2276_s24  }
  0x31   : > { %s331_s8 = scalar_lea.hbm %s2922_s2, %s2266_s28  ;;  %s328_s20 = scalar_lea.vmem [#allocation7], %s2384_s15 }
  0x32   : > { %s335_s21 = sshll.u32 %s328_s20, 4  ;;  %s333_s1 = sshll.u32 %s331_s8, 4  ;;  %s336_s21 = int_to_ptr.vmem [resolvable:$true] %s335_s21  ;;  %s334_s1 = int_to_ptr.hbm [resolvable:$true] %s333_s1 }
  0x33   : > { %1928 = dma.hbm_to_vmem [thread:$0]  (!%p2387_p12), %s334_s1, 16, %s336_s21, %s2396_s10  }
  0x34   : > { %344 = sbr.rel (%p2416_p4) target bundleno = 447 (0x1bf), region = 40  ;;  %s2443_s3 = sand.u32 (!%p2416_p4), 1, %s2254_s25  }
  0x35   : > { %s1450_s24 = sshll.u32 (!%p2416_p4), %s2443_s3, 8  ;;  %s347_s26 = scalar_lea.sflag (!%p2416_p4), [#allocation3], %s2443_s3 }
  0x36   : > { %s2447_s7 = scalar_lea.vmem (!%p2416_p4), [#allocation2], %s1450_s24 }
  0x39   : > { %2229 = dma.done.wait (%p2409_p2), %s347_s26, 4096  }
  0x3a   : > { %2231 = vsyncadd (%p2409_p2), %s347_s26, 4294963200  ;;  %s356_s29 = sand.u32 1, %s2350_s30   ;;  %s359_s12 = scalar_lea.vmem [#allocation5], %s2443_s3 }
  0x3b   : > { %s357_s9 = scalar_lea.sflag [#allocation6], %s356_s29 }
  0x3c   : > { %2233 = dma.done.wait (%p2409_p2), %s357_s9, 32  }
  0x3d   : > { %2235 = vsyncadd (%p2409_p2), %s357_s9, 4294967264  ;;  %s368_s13 = scalar_lea.vmem [#allocation7], %s2443_s3 }
  0x3e   : > { %2237 = dma.done.wait (%p66_p13), [#allocation9], 3072  }
  0x3f   : > { %2239 = vsyncadd (%p66_p13), [#allocation9], 4294964224  ;;  %v1541_v0 = vld [vmem:[#allocation8 + $0xa8] sm:$0xf]  ;;  %v1585_v1 = vld [vmem:[#allocation8 + $0xb0] sm:$0xf0] }
  0x40   : > { %v1584_v2 = vld [vmem:[#allocation8 + $0xac] sm:$0xf]  ;;  %v1542_v3 = vor.u32 %v1585_v1, %v1541_v0  ;;  %v1543_v4 = vld [vmem:[#allocation8 + $0xb4] sm:$0xf0]  ;;  %v1549_v5 = vld [vmem:[#allocation8 + $0xb0] sm:$0xf] }
  0x41   : > { %v1586_v6 = vld [vmem:[#allocation8 + $0xb8] sm:$0xf0]  ;;  %v2466_v7 = vor.u32 %v1584_v2, %v1543_v4  ;;  %v1529_v9 = vld [vmem:[#allocation8 + $0x90] sm:$0xf]  ;;  %v1581_v11 = vld [vmem:[#allocation8 + $0x94] sm:$0xf] }
  0x42   : > { %v2468_v8 = vor.u32 %v1586_v6, %v1549_v5  ;;  %v1582_v10 = vld [vmem:[#allocation8 + $0x98] sm:$0xf0]  ;;  %715 = vmatpush.bf16.msra.mxu0 %v1542_v3  ;;  %1875 = vmatpush.bf16.msra.mxu3 %v1542_v3  ;;  %v1531_v13 = vld [vmem:[#allocation8 + $0x9c] sm:$0xf0]  ;;  %v1537_v14 = vld [vmem:[#allocation8 + $0x98] sm:$0xf] }
  0x43   : > { %v1530_v12 = vor.u32 %v1582_v10, %v1529_v9  ;;  %v1583_v15 = vld [vmem:[#allocation8 + $0xa0] sm:$0xf0]  ;;  %804 = vmatpush.bf16.msra.mxu1 %v2466_v7  ;;  %v2472_v16 = vor.u32 %v1581_v11, %v1531_v13  ;;  %v1517_v18 = vld [vmem:[#allocation8 + $0x78] sm:$0xf]  ;;  %v1578_v20 = vld [vmem:[#allocation8 + $0x7c] sm:$0xf] }
  0x44   : > { %893 = vmatpush.bf16.msra.mxu2 %v2468_v8  ;;  %v2474_v17 = vor.u32 %v1583_v15, %v1537_v14  ;;  %v1579_v19 = vld [vmem:[#allocation8 + $0x80] sm:$0xf0]  ;;  %v1519_v21 = vld [vmem:[#allocation8 + $0x84] sm:$0xf0]  ;;  %v1525_v22 = vld [vmem:[#allocation8 + $0x80] sm:$0xf] }
  0x45   : > { %v1580_v23 = vld [vmem:[#allocation8 + $0x88] sm:$0xf0]  ;;  %v1518_v24 = vor.u32 %v1579_v19, %v1517_v18  ;;  %v2478_v25 = vor.u32 %v1578_v20, %v1519_v21  ;;  %v1505_v27 = vld [vmem:[#allocation8 + $0x60] sm:$0xf]  ;;  %v1575_v29 = vld [vmem:[#allocation8 + $0x64] sm:$0xf] }
  0x46   : > { %716 = vmatpush.bf16.msra.mxu0 %v1530_v12  ;;  %1876 = vmatpush.bf16.msra.mxu3 %v1530_v12  ;;  %v2480_v26 = vor.u32 %v1580_v23, %v1525_v22  ;;  %v1576_v28 = vld [vmem:[#allocation8 + $0x68] sm:$0xf0]  ;;  %v1507_v30 = vld [vmem:[#allocation8 + $0x6c] sm:$0xf0]  ;;  %v1513_v31 = vld [vmem:[#allocation8 + $0x68] sm:$0xf] }
  0x47   : > { %805 = vmatpush.bf16.msra.mxu1 %v2472_v16  ;;  %v1577_v32 = vld [vmem:[#allocation8 + $0x70] sm:$0xf0]  ;;  %v1506_v33 = vor.u32 %v1576_v28, %v1505_v27  ;;  %v2484_v34 = vor.u32 %v1575_v29, %v1507_v30  ;;  %v1493_v36 = vld [vmem:[#allocation8 + $0x48] sm:$0xf]  ;;  %v1572_v38 = vld [vmem:[#allocation8 + $0x4c] sm:$0xf] }
  0x48   : > { %894 = vmatpush.bf16.msra.mxu2 %v2474_v17  ;;  %v2486_v35 = vor.u32 %v1577_v32, %v1513_v31  ;;  %v1573_v37 = vld [vmem:[#allocation8 + $0x50] sm:$0xf0]  ;;  %v1495_v39 = vld [vmem:[#allocation8 + $0x54] sm:$0xf0]  ;;  %v1501_v40 = vld [vmem:[#allocation8 + $0x50] sm:$0xf] }
  0x49   : > { %v1574_v41 = vld [vmem:[#allocation8 + $0x58] sm:$0xf0]  ;;  %v1494_v42 = vor.u32 %v1573_v37, %v1493_v36  ;;  %v1481_v43 = vld [vmem:[#allocation8 + $0x30] sm:$0xf]  ;;  %v2490_v45 = vor.u32 %v1572_v38, %v1495_v39  ;;  %v1569_v47 = vld [vmem:[#allocation8 + $0x34] sm:$0xf] }
  0x4a   : > { %717 = vmatpush.bf16.msra.mxu0 %v1518_v24  ;;  %1877 = vmatpush.bf16.msra.mxu3 %v1518_v24  ;;  %v1570_v44 = vld [vmem:[#allocation8 + $0x38] sm:$0xf0]  ;;  %v2492_v46 = vor.u32 %v1574_v41, %v1501_v40  ;;  %v1483_v48 = vld [vmem:[#allocation8 + $0x3c] sm:$0xf0]  ;;  %v1489_v49 = vld [vmem:[#allocation8 + $0x38] sm:$0xf] }
  0x4b   : > { %806 = vmatpush.bf16.msra.mxu1 %v2478_v25  ;;  %v1571_v50 = vld [vmem:[#allocation8 + $0x40] sm:$0xf0]  ;;  %v427_v51 = vld [vmem:[%s2447_s7] sm:$0xff]  ;;  %v1482_v53 = vor.u32 %v1570_v44, %v1481_v43  ;;  %v2504_v57 = vor.u32 %v1569_v47, %v1483_v48  ;;  %v1469_v59 = vld [vmem:[#allocation8 + $0x18] sm:$0xf]  ;;  %s2635_s17 = sshll.u32 %s2443_s3, 7 }
  0x4c   : > { %895 = vmatpush.bf16.msra.mxu2 %v2480_v26  ;;  %v2497_v52 = vld [vmem:[%s359_s12] ss:$0 sm:$0xff]  ;;  %v428_v54 = vld [vmem:[%s2447_s7 + $0x8] sm:$0xff]  ;;  %v2506_v58 = vor.u32 %v1571_v50, %v1489_v49  ;;  %v1477_v63 = vld [vmem:[#allocation8 + $0x20] sm:$0xf]  ;;  %s2648_s10 = scalar_lea.vmem [#allocation10], %s2635_s17 }
  0x4d   : > { %v451_v55 = vld [vmem:[%s2447_s7 + $0xc0] sm:$0xff]  ;;  %v452_v56 = vld [vmem:[%s2447_s7 + $0xc8] sm:$0xff]  ;;  %v1568_v0 = vld [vmem:[#allocation8 + $0x28] sm:$0xf0]  ;;  %v463_v1 = vmul.f32 %v2497_v52, %v427_v51  ;;  %v464_v2 = vmul.f32 %v2497_v52, %v428_v54  ;;  %s2652_s11 = scalar_lea.vmem [#allocation11], %s2635_s17  ;;  %s2662_s22 = scalar_lea.vmem [#allocation13], %s2635_s17 }
  0x4e   : > { %718 = vmatpush.bf16.msra.mxu0 %v1506_v33  ;;  %1878 = vmatpush.bf16.msra.mxu3 %v1506_v33  ;;  %v1567_v60 = vld [vmem:[#allocation8 + $0x20] sm:$0xf0]  ;;  %v1566_v61 = vld [vmem:[#allocation8 + $0x1c] sm:$0xf]  ;;  %v1471_v62 = vld [vmem:[#allocation8 + $0x24] sm:$0xf0]  ;;  %v487_v4 = vmul.f32 %v2497_v52, %v451_v55  ;;  %v488_v5 = vmul.f32 %v2497_v52, %v452_v56  ;;  %v2518_v10 = vor.u32 %v1568_v0, %v1477_v63 }
  0x4f   : > { %807 = vmatpush.bf16.msra.mxu1 %v2484_v34  ;;  %v2512_v3 = vld [vmem:[%s368_s13] ss:$0 sm:$0xff]  ;;  %v1470_v6 = vor.u32 %v1567_v60, %v1469_v59  ;;  %v1474_v9 = vor.u32 %v1566_v61, %v1471_v62  ;;  %v1457_v11 = vld [vmem:[#allocation8] sm:$0xf]  ;;  %v1564_v12 = vld [vmem:[#allocation8 + $0x8] sm:$0xf0] }
  0x50   : > { %896 = vmatpush.bf16.msra.mxu2 %v2486_v35  ;;  %v1563_v13 = vld [vmem:[#allocation8 + $0x4] sm:$0xf]  ;;  %v1459_v14 = vld [vmem:[#allocation8 + $0xc] sm:$0xf0]  ;;  %v1465_v15 = vld [vmem:[#allocation8 + $0x8] sm:$0xf]  ;;  %v499_v19 = vadd.f32 %v2512_v3, %v463_v1  ;;  %v500_v20 = vadd.f32 %v2512_v3, %v464_v2  ;;  %v523_v21 = vadd.f32 %v2512_v3, %v487_v4  ;;  %v524_v22 = vadd.f32 %v2512_v3, %v488_v5 }
  0x51   : > { %v1565_v18 = vld [vmem:[#allocation8 + $0x10] sm:$0xf0]  ;;  %v1458_v23 = vor.u32 %v1564_v12, %v1457_v11  ;;  %v1462_v24 = vor.u32 %v1563_v13, %v1459_v14  ;;  %v429_v30 = vld [vmem:[%s2447_s7 + $0x10] sm:$0xff]  ;;  %v432_v44 = vld [vmem:[%s2447_s7 + $0x28] sm:$0xff]  ;;  %s1587_s23 = sshll.u32 %s2262_s27, 7  ;;  %s1218_s8 = sshll.u32 %s2652_s11, 4  ;;  %s2816_s8 = int_to_ptr.vmem [resolvable:$true] %s1218_s8 }
  0x52   : > { %719 = vmatpush.bf16.msra.mxu0 %v1494_v42  ;;  %1879 = vmatpush.bf16.msra.mxu3 %v1494_v42  ;;  %v2525_v27 = vor.u32 %v1565_v18, %v1465_v15  ;;  %v531_v28 = vpack.c.bf16 %v500_v20, %v499_v19  ;;  %v2527_v29 = vpack.c.bf16 %v524_v22, %v523_v21  ;;  %v430_v31 = vld [vmem:[%s2447_s7 + $0x18] sm:$0xff]  ;;  %v453_v32 = vld [vmem:[%s2447_s7 + $0xd0] sm:$0xff]  ;;  %v455_v47 = vld [vmem:[%s2447_s7 + $0xe0] sm:$0xff]  ;;  %s1217_s16 = scalar_lea.hbm %s2926_s6, %s1587_s23  ;;  %s1198_s1 = scalar_lea.hbm %s2925_s5, %s1587_s23 }
  0x53   : > { %808 = vmatpush.bf16.msra.mxu1 %v2490_v45  ;;  %v454_v33 = vld [vmem:[%s2447_s7 + $0xd8] sm:$0xff]  ;;  %v465_v36 = vmul.f32 %v2497_v52, %v429_v30  ;;  %v466_v37 = vmul.f32 %v2497_v52, %v430_v31  ;;  %v489_v38 = vmul.f32 %v2497_v52, %v453_v32  ;;  %v456_v48 = vld [vmem:[%s2447_s7 + $0xe8] sm:$0xff]  ;;  %v491_v50 = vmul.f32 %v2497_v52, %v455_v47  ;;  %v433_v59 = vld [vmem:[%s2447_s7 + $0x30] sm:$0xff]  ;;  %s2807_s24 = sshll.u32 %s1217_s16, 4  ;;  %s1199_s27 = sshll.u32 %s2648_s10, 4  ;;  %s1221_s24 = int_to_ptr.hbm [resolvable:$true] %s2807_s24  ;;  %s2823_s27 = int_to_ptr.vmem [resolvable:$true] %s1199_s27 }
  0x54   : > { %897 = vmatpush.bf16.msra.mxu2 %v2492_v46  ;;  %v434_v60 = vld [vmem:[%s2447_s7 + $0x38] sm:$0xff]  ;;  %v457_v61 = vld [vmem:[%s2447_s7 + $0xf0] sm:$0xff]  ;;  %v469_v63 = vmul.f32 %v2497_v52, %v433_v59  ;;  %v436_v11 = vld [vmem:[%s2447_s7 + $0x48] sm:$0xff]  ;;  %s2814_s26 = sshll.u32 %s1198_s1, 4  ;;  %s2955_s12 = sld [smem:[#allocation28_spill]]  ;;  %s1202_s26 = int_to_ptr.hbm [resolvable:$true] %s2814_s26 }
  0x55   : > { %v501_v39 = vadd.f32 %v2512_v3, %v465_v36  ;;  %v502_v40 = vadd.f32 %v2512_v3, %v466_v37  ;;  %v527_v54 = vadd.f32 %v2512_v3, %v491_v50  ;;  %v458_v62 = vld [vmem:[%s2447_s7 + $0xf8] sm:$0xff]  ;;  %v470_v0 = vmul.f32 %v2497_v52, %v434_v60  ;;  %v439_v22 = vld [vmem:[%s2447_s7 + $0x60] sm:$0xff]  ;;  %v441_v32 = vld [vmem:[%s2447_s7 + $0x70] sm:$0xff]  ;;  %s1237_s17 = sshll.u32 %s2662_s22, 4  ;;  %s2834_s18 = scalar_lea.sflag [#allocation12], %s356_s29  ;;  %s1238_s17 = int_to_ptr.vmem [resolvable:$true] %s1237_s17 }
  0x56   : > { %720 = vmatpush.bf16.msra.mxu0 %v1482_v53  ;;  %1880 = vmatpush.bf16.msra.mxu3 %v1482_v53  ;;  %v493_v1 = vmul.f32 %v2497_v52, %v457_v61  ;;  %v505_v2 = vadd.f32 %v2512_v3, %v469_v63  ;;  %v438_v15 = vld [vmem:[%s2447_s7 + $0x58] sm:$0xff]  ;;  %v477_v36 = vmul.f32 %v2497_v52, %v441_v32  ;;  %v445_v50 = vld [vmem:[%s2447_s7 + $0x90] sm:$0xff]  ;;  %s2140_s16 = scalar_lea.hbm %s2926_s6, 256 }
  0x57   : > { %809 = vmatpush.bf16.msra.mxu1 %v2504_v57  ;;  %v532_v42 = vpack.c.bf16 %v502_v40, %v501_v39  ;;  %v506_v4 = vadd.f32 %v2512_v3, %v470_v0  ;;  %v443_v40 = vld [vmem:[%s2447_s7 + $0x80] sm:$0xff] }
  0x58   : > { %898 = vmatpush.bf16.msra.mxu2 %v2506_v58  ;;  %v529_v5 = vadd.f32 %v2512_v3, %v493_v1 }
  0x5a   : > { %721 = vmatpush.bf16.msra.mxu0 %v1470_v6  ;;  %1881 = vmatpush.bf16.msra.mxu3 %v1470_v6  ;;  %v534_v6 = vpack.c.bf16 %v506_v4, %v505_v2  ;;  %s1236_s13 = scalar_lea.hbm %s2955_s12, %s1587_s23  ;;  %s2134_s23 = sshra.s32 %s1221_s24, 4  ;;  %s2135_s23 = int_to_ptr.hbm [resolvable:$true] %s2134_s23 }
  0x5b   : > { %810 = vmatpush.bf16.msra.mxu1 %v1474_v9  ;;  %s2827_s15 = sshll.u32 %s1236_s13, 4  ;;  %p2141_p12 = scmp.lt.s32.totalorder %s2135_s23, %s2926_s6  ;;  %s1240_s15 = int_to_ptr.hbm [resolvable:$true] %s2827_s15 }
  0x5c   : > { %899 = vmatpush.bf16.msra.mxu2 %v2518_v10 }
  0x5e   : > { %722 = vmatpush.bf16.msra.mxu0 %v1458_v23  ;;  %1882 = vmatpush.bf16.msra.mxu3 %v1458_v23  ;;  %v440_v23 = vld [vmem:[%s2447_s7 + $0x68] sm:$0xff] }
  0x5f   : > { %811 = vmatpush.bf16.msra.mxu1 %v1462_v24 }
  0x60   : > { %900 = vmatpush.bf16.msra.mxu2 %v2525_v27 }
  0x61   : > { %723 = vmatmul.bf16.vlgmr.msra.gmra.mxu0 %v531_v28  ;;  %783 = vmatmul.bf16.vlgmr.msra.gmra.mxu3 %v2527_v29 }
  0x62   : > { %1883 = vmatpush.bf16.msrb.mxu3 %v2466_v7  ;;  %812 = vmatmul.bf16.vlgmr.msra.gmra.mxu1 %v531_v28  ;;  %v490_v7 = vmul.f32 %v2497_v52, %v454_v33  ;;  %v442_v33 = vld [vmem:[%s2447_s7 + $0x78] sm:$0xff] }
  0x63   : > { %901 = vmatmul.bf16.vlgmr.msra.gmra.mxu2 %v531_v28  ;;  %v478_v37 = vmul.f32 %v2497_v52, %v442_v33 }
  0x64   : > { %v526_v41 = vadd.f32 %v2512_v3, %v490_v7 }
  0x65   : > { %v514_v7 = vadd.f32 %v2512_v3, %v478_v37 }
  0x66   : > { %1884 = vmatpush.bf16.msrb.mxu3 %v2472_v16  ;;  %v525_v16 = vadd.f32 %v2512_v3, %v489_v38  ;;  %v513_v38 = vadd.f32 %v2512_v3, %v477_v36 }
  0x68   : > { %v2547_v43 = vpack.c.bf16 %v526_v41, %v525_v16  ;;  %v538_v39 = vpack.c.bf16 %v514_v7, %v513_v38  ;;  %v444_v16 = vld [vmem:[%s2447_s7 + $0x88] sm:$0xff]  ;;  %v479_v41 = vmul.f32 %v2497_v52, %v443_v40 }
  0x6a   : > { %1885 = vmatpush.bf16.msrb.mxu3 %v2478_v25  ;;  %v431_v25 = vld [vmem:[%s2447_s7 + $0x20] sm:$0xff] }
  0x6b   : > { %v467_v49 = vmul.f32 %v2497_v52, %v431_v25  ;;  %v515_v25 = vadd.f32 %v2512_v3, %v479_v41 }
  0x6d   : > { %v503_v51 = vadd.f32 %v2512_v3, %v467_v49 }
  0x6e   : > { %1886 = vmatpush.bf16.msrb.mxu3 %v2484_v34  ;;  %v468_v34 = vmul.f32 %v2497_v52, %v432_v44 }
  0x70   : > { %v504_v53 = vadd.f32 %v2512_v3, %v468_v34  ;;  %v579_v34 = vld [vmem:[%s2924_s4] sm:$0x7] }
  0x71   : > { %728 = vmatmul.bf16.gmra.mxu0 %v532_v42  ;;  %788 = vmatmul.bf16.gmra.mxu3 %v2547_v43  ;;  %v2645_v4 = vperm.slane %v579_v34, 2 }
  0x72   : > { %1887 = vmatpush.bf16.msrb.mxu3 %v2490_v45  ;;  %817 = vmatmul.bf16.gmra.mxu1 %v532_v42  ;;  %v492_v45 = vmul.f32 %v2497_v52, %v456_v48  ;;  %v533_v56 = vpack.c.bf16 %v504_v53, %v503_v51  ;;  %v2630_v51 = vperm.slane %v579_v34, 0  ;;  %v2632_v53 = vperm.slane %v579_v34, 1 }
  0x73   : > { %906 = vmatmul.bf16.gmra.mxu2 %v532_v42  ;;  %v480_v42 = vmul.f32 %v2497_v52, %v444_v16 }
  0x74   : > { %v528_v55 = vadd.f32 %v2512_v3, %v492_v45  ;;  %v446_v45 = vld [vmem:[%s2447_s7 + $0x98] sm:$0xff] }
  0x75   : > { %v516_v44 = vadd.f32 %v2512_v3, %v480_v42  ;;  %v482_v59 = vmul.f32 %v2497_v52, %v446_v45 }
  0x76   : > { %1888 = vmatpush.bf16.msrb.mxu3 %v2504_v57  ;;  %v2564_v57 = vpack.c.bf16 %v528_v55, %v527_v54 }
  0x77   : > { %v539_v47 = vpack.c.bf16 %v516_v44, %v515_v25  ;;  %v518_v2 = vadd.f32 %v2512_v3, %v482_v59 }
  0x7a   : > { %1889 = vmatpush.bf16.msrb.mxu3 %v1474_v9 }
  0x7e   : > { %1890 = vmatpush.bf16.msrb.mxu3 %v1462_v24  ;;  %v475_v24 = vmul.f32 %v2497_v52, %v439_v22 }
  0x80   : > { %v511_v28 = vadd.f32 %v2512_v3, %v475_v24 }
  0x81   : > { %733 = vmatmul.bf16.gmra.mxu0 %v533_v56  ;;  %793 = vmatmul.bf16.gmra.mxu3 %v2564_v57 }
  0x82   : > { %1891 = vmatpush.bf16.msra.mxu3 %v2468_v8  ;;  %822 = vmatmul.bf16.gmra.mxu1 %v533_v56  ;;  %v494_v8 = vmul.f32 %v2497_v52, %v458_v62 }
  0x83   : > { %911 = vmatmul.bf16.gmra.mxu2 %v533_v56  ;;  %v481_v56 = vmul.f32 %v2497_v52, %v445_v50 }
  0x86   : > { %1892 = vmatpush.bf16.msra.mxu3 %v2474_v17  ;;  %v530_v17 = vadd.f32 %v2512_v3, %v494_v8  ;;  %v517_v8 = vadd.f32 %v2512_v3, %v481_v56 }
  0x88   : > { %v2583_v9 = vpack.c.bf16 %v530_v17, %v529_v5 }
  0x8a   : > { %1893 = vmatpush.bf16.msra.mxu3 %v2480_v26  ;;  %v435_v26 = vld [vmem:[%s2447_s7 + $0x40] sm:$0xff] }
  0x8b   : > { %v471_v12 = vmul.f32 %v2497_v52, %v435_v26 }
  0x8d   : > { %v507_v13 = vadd.f32 %v2512_v3, %v471_v12  ;;  %v540_v12 = vpack.c.bf16 %v518_v2, %v517_v8 }
  0x8e   : > { %1894 = vmatpush.bf16.msra.mxu3 %v2486_v35  ;;  %v472_v35 = vmul.f32 %v2497_v52, %v436_v11 }
  0x91   : > { %738 = vmatmul.bf16.gmra.mxu0 %v534_v6  ;;  %798 = vmatmul.bf16.gmra.mxu3 %v2583_v9 }
  0x92   : > { %1895 = vmatpush.bf16.msra.mxu3 %v2492_v46  ;;  %827 = vmatmul.bf16.gmra.mxu1 %v534_v6  ;;  %v508_v46 = vadd.f32 %v2512_v3, %v472_v35 }
  0x93   : > { %916 = vmatmul.bf16.gmra.mxu2 %v534_v6 }
  0x94   : > { %v535_v14 = vpack.c.bf16 %v508_v46, %v507_v13 }
  0x96   : > { %1896 = vmatpush.bf16.msra.mxu3 %v2506_v58  ;;  %v437_v58 = vld [vmem:[%s2447_s7 + $0x50] sm:$0xff] }
  0x97   : > { %v473_v18 = vmul.f32 %v2497_v52, %v437_v58 }
  0x99   : > { %v509_v19 = vadd.f32 %v2512_v3, %v473_v18  ;;  %v447_v18 = vld [vmem:[%s2447_s7 + $0xa0] sm:$0xff] }
  0x9a   : > { %1897 = vmatpush.bf16.msra.mxu3 %v2518_v10  ;;  %v474_v10 = vmul.f32 %v2497_v52, %v438_v15 }
  0x9c   : > { %v510_v20 = vadd.f32 %v2512_v3, %v474_v10  ;;  %v448_v10 = vld [vmem:[%s2447_s7 + $0xa8] sm:$0xff] }
  0x9d   : > { %v484_v22 = vmul.f32 %v2497_v52, %v448_v10 }
  0x9e   : > { %1898 = vmatpush.bf16.msra.mxu3 %v2525_v27  ;;  %v536_v21 = vpack.c.bf16 %v510_v20, %v509_v19  ;;  %v476_v27 = vmul.f32 %v2497_v52, %v440_v23 }
  0x9f   : > { %v520_v33 = vadd.f32 %v2512_v3, %v484_v22 }
  0xa0   : > { %v512_v30 = vadd.f32 %v2512_v3, %v476_v27 }
  0xa1   : > { %743 = vmatmul.bf16.gmra.mxu0 %v535_v14  ;;  %872 = vmatmul.bf16.vlgmr.msrb.gmra.mxu3 %v2527_v29 }
  0xa2   : > { %832 = vmatmul.bf16.gmra.mxu1 %v535_v14  ;;  %v537_v31 = vpack.c.bf16 %v512_v30, %v511_v28 }
  0xa3   : > { %921 = vmatmul.bf16.gmra.mxu2 %v535_v14 }
  0xb1   : > { %748 = vmatmul.bf16.gmra.mxu0 %v536_v21  ;;  %877 = vmatmul.bf16.gmra.mxu3 %v2547_v43 }
  0xb2   : > { %837 = vmatmul.bf16.gmra.mxu1 %v536_v21 }
  0xb3   : > { %926 = vmatmul.bf16.gmra.mxu2 %v536_v21  ;;  %v483_v21 = vmul.f32 %v2497_v52, %v447_v18 }
  0xb5   : > { %v519_v32 = vadd.f32 %v2512_v3, %v483_v21 }
  0xb7   : > { %v541_v40 = vpack.c.bf16 %v520_v33, %v519_v32 }
  0xc1   : > { %753 = vmatmul.bf16.gmra.mxu0 %v537_v31  ;;  %882 = vmatmul.bf16.gmra.mxu3 %v2564_v57 }
  0xc2   : > { %842 = vmatmul.bf16.gmra.mxu1 %v537_v31 }
  0xc3   : > { %931 = vmatmul.bf16.gmra.mxu2 %v537_v31 }
  0xd1   : > { %758 = vmatmul.bf16.gmra.mxu0 %v538_v39  ;;  %887 = vmatmul.bf16.gmra.mxu3 %v2583_v9 }
  0xd2   : > { %847 = vmatmul.bf16.gmra.mxu1 %v538_v39 }
  0xd3   : > { %936 = vmatmul.bf16.gmra.mxu2 %v538_v39 }
  0xde   : > { %v724_v48 = vpop.f32.mrf.mxu0 }
  0xdf   : > { %v813_v49 = vpop.f32.mrf.mxu1 }
  0xe0   : > { %v814_v63 = vadd.f32 %v813_v49, %v2632_v53  ;;  %v450_v49 = vld [vmem:[%s2447_s7 + $0xb8] sm:$0xff] }
  0xe1   : > { %763 = vmatmul.bf16.gmra.mxu0 %v539_v47  ;;  %961 = vmatmul.bf16.vlgmr.msra.gmra.mxu3 %v2527_v29  ;;  %v725_v29 = vadd.f32 %v724_v48, %v2630_v51  ;;  %v449_v48 = vld [vmem:[%s2447_s7 + $0xb0] sm:$0xff] }
  0xe2   : > { %852 = vmatmul.bf16.gmra.mxu1 %v539_v47  ;;  %v485_v45 = vmul.f32 %v2497_v52, %v449_v48 }
  0xe3   : > { %941 = vmatmul.bf16.gmra.mxu2 %v539_v47 }
  0xe4   : > { %v784_v54 = vpop.f32.mrf.mxu3 }
  0xe5   : > { %v785_v6 = vadd.f32 %v784_v54, %v2630_v51  ;;  %v486_v54 = vmul.f32 %v2497_v52, %v450_v49 }
  0xe6   : > { %v902_v55 = vpop.f32.mrf.mxu2  ;;  %v726_v60 = vpop.f32.mrf.mxu0 }
  0xe7   : > { %v727_v61 = vadd.f32 %v726_v60, %v2630_v51  ;;  %v815_v62 = vpop.f32.mrf.mxu1  ;;  %v903_v35 = vadd.f32 %v902_v55, %v2645_v4 }
  0xe8   : > { %v816_v0 = vadd.f32 %v815_v62, %v2632_v53  ;;  %v521_v62 = vadd.f32 %v2512_v3, %v485_v45 }
  0xe9   : > { %v1593_v1 = vpack.c.bf16 %v727_v61, %v725_v29 }
  0xea   : > { %v1673_v5 = vpack.c.bf16 %v816_v0, %v814_v63  ;;  %v522_v63 = vadd.f32 %v2512_v3, %v486_v54 }
  0xeb   : > { %1594 = vst [vmem:[%s2648_s10] sm:$0xff] %v1593_v1  }
  0xec   : > { %1674 = vst [vmem:[%s2652_s11] sm:$0xff] %v1673_v5   ;;  %v786_v17 = vpop.f32.mrf.mxu3  ;;  %v542_v5 = vpack.c.bf16 %v522_v63, %v521_v62 }
  0xed   : > { %v787_v26 = vadd.f32 %v786_v17, %v2630_v51 }
  0xee   : > { %v904_v11 = vpop.f32.mrf.mxu2  ;;  %v729_v46 = vpop.f32.mrf.mxu0 }
  0xef   : > { %v905_v13 = vadd.f32 %v904_v11, %v2645_v4  ;;  %v1653_v14 = vpack.c.bf16 %v787_v26, %v785_v6  ;;  %v818_v58 = vpop.f32.mrf.mxu1  ;;  %v730_v24 = vadd.f32 %v729_v46, %v2630_v51 }
  0xf0   : > { %v819_v28 = vadd.f32 %v818_v58, %v2632_v53 }
  0xf1   : > { %v1753_v15 = vpack.c.bf16 %v905_v13, %v903_v35  ;;  %1841 = vst [vmem:[%s2648_s10 + $0x60] sm:$0xff] %v1653_v14   ;;  %768 = vmatmul.bf16.gmra.mxu0 %v540_v12  ;;  %966 = vmatmul.bf16.gmra.mxu3 %v2547_v43 }
  0xf2   : > { %857 = vmatmul.bf16.gmra.mxu1 %v540_v12 }
  0xf3   : > { %1754 = vst [vmem:[%s2662_s22] sm:$0xff] %v1753_v15   ;;  %946 = vmatmul.bf16.gmra.mxu2 %v540_v12 }
  0xf4   : > { %v789_v19 = vpop.f32.mrf.mxu3 }
  0xf5   : > { %v790_v38 = vadd.f32 %v789_v19, %v2630_v51 }
  0xf6   : > { %v907_v20 = vpop.f32.mrf.mxu2  ;;  %v731_v23 = vpop.f32.mrf.mxu0 }
  0xf7   : > { %v732_v43 = vadd.f32 %v731_v23, %v2630_v51  ;;  %v820_v27 = vpop.f32.mrf.mxu1  ;;  %v908_v16 = vadd.f32 %v907_v20, %v2645_v4 }
  0xf8   : > { %v821_v30 = vadd.f32 %v820_v27, %v2632_v53 }
  0xf9   : > { %v1598_v31 = vpack.c.bf16 %v732_v43, %v730_v24 }
  0xfa   : > { %v1678_v36 = vpack.c.bf16 %v821_v30, %v819_v28 }
  0xfb   : > { %1830 = vst [vmem:[%s2648_s10 + $0x8] sm:$0xff] %v1598_v31  }
  0xfc   : > { %1845 = vst [vmem:[%s2652_s11 + $0x8] sm:$0xff] %v1678_v36   ;;  %v791_v37 = vpop.f32.mrf.mxu3 }
  0xfd   : > { %v792_v7 = vadd.f32 %v791_v37, %v2630_v51 }
  0xfe   : > { %v909_v39 = vpop.f32.mrf.mxu2  ;;  %v734_v42 = vpop.f32.mrf.mxu0 }
  0xff   : > { %v910_v41 = vadd.f32 %v909_v39, %v2645_v4  ;;  %v1658_v25 = vpack.c.bf16 %v792_v7, %v790_v38  ;;  %v823_v44 = vpop.f32.mrf.mxu1  ;;  %v735_v56 = vadd.f32 %v734_v42, %v2630_v51 }
 0x101   : > { %v1758_v47 = vpack.c.bf16 %v910_v41, %v908_v16  ;;  %1842 = vst [vmem:[%s2648_s10 + $0x68] sm:$0xff] %v1658_v25   ;;  %773 = vmatmul.bf16.gmra.mxu0 %v541_v40  ;;  %971 = vmatmul.bf16.gmra.mxu3 %v2564_v57  ;;  %v824_v57 = vadd.f32 %v823_v44, %v2632_v53 }
 0x102   : > { %862 = vmatmul.bf16.gmra.mxu1 %v541_v40 }
 0x103   : > { %1860 = vst [vmem:[%s2662_s22 + $0x8] sm:$0xff] %v1758_v47   ;;  %951 = vmatmul.bf16.gmra.mxu2 %v541_v40 }
 0x104   : > { %v794_v34 = vpop.f32.mrf.mxu3 }
 0x105   : > { %v795_v1 = vadd.f32 %v794_v34, %v2630_v51 }
 0x106   : > { %v912_v50 = vpop.f32.mrf.mxu2  ;;  %v736_v55 = vpop.f32.mrf.mxu0 }
 0x107   : > { %v737_v59 = vadd.f32 %v736_v55, %v2630_v51  ;;  %v825_v60 = vpop.f32.mrf.mxu1  ;;  %v913_v17 = vadd.f32 %v912_v50, %v2645_v4 }
 0x108   : > { %v826_v29 = vadd.f32 %v825_v60, %v2632_v53 }
 0x109   : > { %v1603_v61 = vpack.c.bf16 %v737_v59, %v735_v56 }
 0x10a   : > { %v1683_v0 = vpack.c.bf16 %v826_v29, %v824_v57 }
 0x10b   : > { %1831 = vst [vmem:[%s2648_s10 + $0x10] sm:$0xff] %v1603_v61  }
 0x10c   : > { %1846 = vst [vmem:[%s2652_s11 + $0x10] sm:$0xff] %v1683_v0   ;;  %v796_v52 = vpop.f32.mrf.mxu3 }
 0x10d   : > { %v797_v8 = vadd.f32 %v796_v52, %v2630_v51 }
 0x10e   : > { %v914_v2 = vpop.f32.mrf.mxu2  ;;  %v739_v26 = vpop.f32.mrf.mxu0 }
 0x10f   : > { %v915_v6 = vadd.f32 %v914_v2, %v2645_v4  ;;  %v1663_v11 = vpack.c.bf16 %v797_v8, %v795_v1  ;;  %v828_v12 = vpop.f32.mrf.mxu1  ;;  %v740_v14 = vadd.f32 %v739_v26, %v2630_v51 }
 0x110   : > { %v829_v18 = vadd.f32 %v828_v12, %v2632_v53 }
 0x111   : > { %v1763_v35 = vpack.c.bf16 %v915_v6, %v913_v17  ;;  %1843 = vst [vmem:[%s2648_s10 + $0x70] sm:$0xff] %v1663_v11   ;;  %778 = vmatmul.bf16.gmra.mxu0 %v542_v5  ;;  %976 = vmatmul.bf16.gmra.mxu3 %v2583_v9 }
 0x112   : > { %867 = vmatmul.bf16.gmra.mxu1 %v542_v5 }
 0x113   : > { %1861 = vst [vmem:[%s2662_s22 + $0x10] sm:$0xff] %v1763_v35   ;;  %956 = vmatmul.bf16.gmra.mxu2 %v542_v5 }
 0x114   : > { %v799_v3 = vpop.f32.mrf.mxu3 }
 0x115   : > { %v800_v21 = vadd.f32 %v799_v3, %v2630_v51 }
 0x116   : > { %v917_v13 = vpop.f32.mrf.mxu2  ;;  %v741_v46 = vpop.f32.mrf.mxu0 }
 0x117   : > { %v742_v58 = vadd.f32 %v741_v46, %v2630_v51  ;;  %v830_v15 = vpop.f32.mrf.mxu1  ;;  %v918_v24 = vadd.f32 %v917_v13, %v2645_v4 }
 0x118   : > { %v831_v10 = vadd.f32 %v830_v15, %v2632_v53 }
 0x119   : > { %v1608_v19 = vpack.c.bf16 %v742_v58, %v740_v14 }
 0x11a   : > { %v1688_v20 = vpack.c.bf16 %v831_v10, %v829_v18 }
 0x11b   : > { %1832 = vst [vmem:[%s2648_s10 + $0x18] sm:$0xff] %v1608_v19  }
 0x11c   : > { %1847 = vst [vmem:[%s2652_s11 + $0x18] sm:$0xff] %v1688_v20   ;;  %v801_v9 = vpop.f32.mrf.mxu3 }
 0x11d   : > { %v802_v22 = vadd.f32 %v801_v9, %v2630_v51 }
 0x11e   : > { %v919_v23 = vpop.f32.mrf.mxu2  ;;  %v744_v27 = vpop.f32.mrf.mxu0 }
 0x11f   : > { %v920_v43 = vadd.f32 %v919_v23, %v2645_v4  ;;  %v1668_v28 = vpack.c.bf16 %v802_v22, %v800_v21  ;;  %v833_v30 = vpop.f32.mrf.mxu1  ;;  %v745_v37 = vadd.f32 %v744_v27, %v2630_v51 }
 0x120   : > { %v834_v39 = vadd.f32 %v833_v30, %v2632_v53 }
 0x121   : > { %v1768_v31 = vpack.c.bf16 %v920_v43, %v918_v24  ;;  %1844 = vst [vmem:[%s2648_s10 + $0x78] sm:$0xff] %v1668_v28  }
 0x123   : > { %1862 = vst [vmem:[%s2662_s22 + $0x18] sm:$0xff] %v1768_v31  }
 0x124   : > { %v873_v32 = vpop.f32.mrf.mxu3 }
 0x125   : > { %v874_v25 = vadd.f32 %v873_v32, %v2632_v53 }
 0x126   : > { %v922_v33 = vpop.f32.mrf.mxu2  ;;  %v746_v36 = vpop.f32.mrf.mxu0 }
 0x127   : > { %v747_v38 = vadd.f32 %v746_v36, %v2630_v51  ;;  %v835_v7 = vpop.f32.mrf.mxu1  ;;  %v923_v48 = vadd.f32 %v922_v33, %v2645_v4 }
 0x128   : > { %v836_v40 = vadd.f32 %v835_v7, %v2632_v53 }
 0x129   : > { %v1613_v16 = vpack.c.bf16 %v747_v38, %v745_v37 }
 0x12a   : > { %v1693_v41 = vpack.c.bf16 %v836_v40, %v834_v39 }
 0x12b   : > { %1833 = vst [vmem:[%s2648_s10 + $0x20] sm:$0xff] %v1613_v16  }
 0x12c   : > { %1848 = vst [vmem:[%s2652_s11 + $0x20] sm:$0xff] %v1693_v41   ;;  %v875_v42 = vpop.f32.mrf.mxu3 }
 0x12d   : > { %v876_v44 = vadd.f32 %v875_v42, %v2632_v53 }
 0x12e   : > { %v924_v47 = vpop.f32.mrf.mxu2  ;;  %v749_v34 = vpop.f32.mrf.mxu0 }
 0x12f   : > { %v925_v49 = vadd.f32 %v924_v47, %v2645_v4  ;;  %v1733_v50 = vpack.c.bf16 %v876_v44, %v874_v25  ;;  %v838_v45 = vpop.f32.mrf.mxu1  ;;  %v750_v60 = vadd.f32 %v749_v34, %v2630_v51 }
 0x130   : > { %v839_v61 = vadd.f32 %v838_v45, %v2632_v53 }
 0x131   : > { %v1773_v54 = vpack.c.bf16 %v925_v49, %v923_v48  ;;  %1856 = vst [vmem:[%s2652_s11 + $0x60] sm:$0xff] %v1733_v50  }
 0x133   : > { %1863 = vst [vmem:[%s2662_s22 + $0x20] sm:$0xff] %v1773_v54  }
 0x134   : > { %v878_v55 = vpop.f32.mrf.mxu3 }
 0x135   : > { %v879_v1 = vadd.f32 %v878_v55, %v2632_v53 }
 0x136   : > { %v927_v56 = vpop.f32.mrf.mxu2  ;;  %v751_v59 = vpop.f32.mrf.mxu0 }
 0x137   : > { %v752_v57 = vadd.f32 %v751_v59, %v2630_v51  ;;  %v840_v29 = vpop.f32.mrf.mxu1  ;;  %v928_v5 = vadd.f32 %v927_v56, %v2645_v4 }
 0x138   : > { %v841_v62 = vadd.f32 %v840_v29, %v2632_v53 }
 0x139   : > { %v1618_v63 = vpack.c.bf16 %v752_v57, %v750_v60 }
 0x13a   : > { %v1698_v0 = vpack.c.bf16 %v841_v62, %v839_v61 }
 0x13b   : > { %1834 = vst [vmem:[%s2648_s10 + $0x28] sm:$0xff] %v1618_v63  }
 0x13c   : > { %1849 = vst [vmem:[%s2652_s11 + $0x28] sm:$0xff] %v1698_v0   ;;  %v880_v52 = vpop.f32.mrf.mxu3 }
 0x13d   : > { %v881_v8 = vadd.f32 %v880_v52, %v2632_v53 }
 0x13e   : > { %v929_v2 = vpop.f32.mrf.mxu2  ;;  %v754_v6 = vpop.f32.mrf.mxu0 }
 0x13f   : > { %v930_v17 = vadd.f32 %v929_v2, %v2645_v4  ;;  %v1738_v26 = vpack.c.bf16 %v881_v8, %v879_v1  ;;  %v843_v11 = vpop.f32.mrf.mxu1  ;;  %v755_v46 = vadd.f32 %v754_v6, %v2630_v51 }
 0x140   : > { %v844_v15 = vadd.f32 %v843_v11, %v2632_v53 }
 0x141   : > { %v1778_v12 = vpack.c.bf16 %v930_v17, %v928_v5  ;;  %1857 = vst [vmem:[%s2652_s11 + $0x68] sm:$0xff] %v1738_v26  }
 0x143   : > { %1864 = vst [vmem:[%s2662_s22 + $0x28] sm:$0xff] %v1778_v12  }
 0x144   : > { %v883_v35 = vpop.f32.mrf.mxu3 }
 0x145   : > { %v884_v9 = vadd.f32 %v883_v35, %v2632_v53 }
 0x146   : > { %v932_v3 = vpop.f32.mrf.mxu2  ;;  %v756_v13 = vpop.f32.mrf.mxu0 }
 0x147   : > { %v757_v14 = vadd.f32 %v756_v13, %v2630_v51  ;;  %v845_v58 = vpop.f32.mrf.mxu1  ;;  %v933_v23 = vadd.f32 %v932_v3, %v2645_v4 }
 0x148   : > { %v846_v18 = vadd.f32 %v845_v58, %v2632_v53 }
 0x149   : > { %v1623_v10 = vpack.c.bf16 %v757_v14, %v755_v46 }
 0x14a   : > { %v1703_v19 = vpack.c.bf16 %v846_v18, %v844_v15 }
 0x14b   : > { %1835 = vst [vmem:[%s2648_s10 + $0x30] sm:$0xff] %v1623_v10  }
 0x14c   : > { %1850 = vst [vmem:[%s2652_s11 + $0x30] sm:$0xff] %v1703_v19   ;;  %v885_v20 = vpop.f32.mrf.mxu3 }
 0x14d   : > { %v886_v21 = vadd.f32 %v885_v20, %v2632_v53 }
 0x14e   : > { %v934_v22 = vpop.f32.mrf.mxu2  ;;  %v759_v43 = vpop.f32.mrf.mxu0 }
 0x14f   : > { %v935_v24 = vadd.f32 %v934_v22, %v2645_v4  ;;  %v1743_v27 = vpack.c.bf16 %v886_v21, %v884_v9  ;;  %v848_v28 = vpop.f32.mrf.mxu1  ;;  %v760_v36 = vadd.f32 %v759_v43, %v2630_v51 }
 0x150   : > { %v849_v7 = vadd.f32 %v848_v28, %v2632_v53 }
 0x151   : > { %v1783_v30 = vpack.c.bf16 %v935_v24, %v933_v23  ;;  %1858 = vst [vmem:[%s2652_s11 + $0x70] sm:$0xff] %v1743_v27  }
 0x153   : > { %1865 = vst [vmem:[%s2662_s22 + $0x30] sm:$0xff] %v1783_v30  }
 0x154   : > { %v888_v31 = vpop.f32.mrf.mxu3 }
 0x155   : > { %v889_v42 = vadd.f32 %v888_v31, %v2632_v53 }
 0x156   : > { %v937_v32 = vpop.f32.mrf.mxu2  ;;  %v761_v33 = vpop.f32.mrf.mxu0 }
 0x157   : > { %v762_v37 = vadd.f32 %v761_v33, %v2630_v51  ;;  %v850_v38 = vpop.f32.mrf.mxu1  ;;  %v938_v47 = vadd.f32 %v937_v32, %v2645_v4 }
 0x158   : > { %v851_v39 = vadd.f32 %v850_v38, %v2632_v53 }
 0x159   : > { %v1628_v40 = vpack.c.bf16 %v762_v37, %v760_v36 }
 0x15a   : > { %v1708_v16 = vpack.c.bf16 %v851_v39, %v849_v7 }
 0x15b   : > { %1836 = vst [vmem:[%s2648_s10 + $0x38] sm:$0xff] %v1628_v40  }
 0x15c   : > { %1851 = vst [vmem:[%s2652_s11 + $0x38] sm:$0xff] %v1708_v16   ;;  %v890_v41 = vpop.f32.mrf.mxu3 }
 0x15d   : > { %v891_v25 = vadd.f32 %v890_v41, %v2632_v53 }
 0x15e   : > { %v939_v44 = vpop.f32.mrf.mxu2  ;;  %v764_v49 = vpop.f32.mrf.mxu0 }
 0x15f   : > { %v940_v48 = vadd.f32 %v939_v44, %v2645_v4  ;;  %v1748_v34 = vpack.c.bf16 %v891_v25, %v889_v42  ;;  %v853_v50 = vpop.f32.mrf.mxu1  ;;  %v765_v59 = vadd.f32 %v764_v49, %v2630_v51 }
 0x160   : > { %v854_v29 = vadd.f32 %v853_v50, %v2632_v53 }
 0x161   : > { %v1788_v45 = vpack.c.bf16 %v940_v48, %v938_v47  ;;  %1859 = vst [vmem:[%s2652_s11 + $0x78] sm:$0xff] %v1748_v34  }
 0x163   : > { %1866 = vst [vmem:[%s2662_s22 + $0x38] sm:$0xff] %v1788_v45  }
 0x164   : > { %v962_v54 = vpop.f32.mrf.mxu3 }
 0x165   : > { %v963_v52 = vadd.f32 %v962_v54, %v2645_v4 }
 0x166   : > { %v942_v55 = vpop.f32.mrf.mxu2  ;;  %v766_v56 = vpop.f32.mrf.mxu0 }
 0x167   : > { %v767_v60 = vadd.f32 %v766_v56, %v2630_v51  ;;  %v855_v57 = vpop.f32.mrf.mxu1  ;;  %v943_v2 = vadd.f32 %v942_v55, %v2645_v4 }
 0x168   : > { %v856_v61 = vadd.f32 %v855_v57, %v2632_v53 }
 0x169   : > { %v1633_v62 = vpack.c.bf16 %v767_v60, %v765_v59 }
 0x16a   : > { %v1713_v63 = vpack.c.bf16 %v856_v61, %v854_v29 }
 0x16b   : > { %1837 = vst [vmem:[%s2648_s10 + $0x40] sm:$0xff] %v1633_v62  }
 0x16c   : > { %1852 = vst [vmem:[%s2652_s11 + $0x40] sm:$0xff] %v1713_v63   ;;  %v964_v0 = vpop.f32.mrf.mxu3 }
 0x16d   : > { %v965_v8 = vadd.f32 %v964_v0, %v2645_v4 }
 0x16e   : > { %v944_v1 = vpop.f32.mrf.mxu2  ;;  %v769_v17 = vpop.f32.mrf.mxu0 }
 0x16f   : > { %v945_v5 = vadd.f32 %v944_v1, %v2645_v4  ;;  %v1813_v6 = vpack.c.bf16 %v965_v8, %v963_v52  ;;  %v858_v26 = vpop.f32.mrf.mxu1  ;;  %v770_v13 = vadd.f32 %v769_v17, %v2630_v51 }
 0x170   : > { %v859_v58 = vadd.f32 %v858_v26, %v2632_v53 }
 0x171   : > { %v1793_v11 = vpack.c.bf16 %v945_v5, %v943_v2  ;;  %1871 = vst [vmem:[%s2662_s22 + $0x60] sm:$0xff] %v1813_v6  }
 0x173   : > { %1867 = vst [vmem:[%s2662_s22 + $0x40] sm:$0xff] %v1793_v11  }
 0x174   : > { %v967_v12 = vpop.f32.mrf.mxu3 }
 0x175   : > { %v968_v20 = vadd.f32 %v967_v12, %v2645_v4 }
 0x176   : > { %v947_v35 = vpop.f32.mrf.mxu2  ;;  %v771_v3 = vpop.f32.mrf.mxu0 }
 0x177   : > { %v772_v46 = vadd.f32 %v771_v3, %v2630_v51  ;;  %v860_v14 = vpop.f32.mrf.mxu1  ;;  %v948_v22 = vadd.f32 %v947_v35, %v2645_v4 }
 0x178   : > { %v861_v15 = vadd.f32 %v860_v14, %v2632_v53 }
 0x179   : > { %v1638_v18 = vpack.c.bf16 %v772_v46, %v770_v13 }
 0x17a   : > { %v1718_v10 = vpack.c.bf16 %v861_v15, %v859_v58 }
 0x17b   : > { %1838 = vst [vmem:[%s2648_s10 + $0x48] sm:$0xff] %v1638_v18  }
 0x17c   : > { %1853 = vst [vmem:[%s2652_s11 + $0x48] sm:$0xff] %v1718_v10   ;;  %v969_v19 = vpop.f32.mrf.mxu3 }
 0x17d   : > { %v970_v21 = vadd.f32 %v969_v19, %v2645_v4 }
 0x17e   : > { %v949_v9 = vpop.f32.mrf.mxu2  ;;  %v774_v24 = vpop.f32.mrf.mxu0 }
 0x17f   : > { %v950_v23 = vadd.f32 %v949_v9, %v2645_v4  ;;  %v1818_v43 = vpack.c.bf16 %v970_v21, %v968_v20  ;;  %v863_v27 = vpop.f32.mrf.mxu1  ;;  %v775_v33 = vadd.f32 %v774_v24, %v2630_v51 }
 0x180   : > { %v864_v38 = vadd.f32 %v863_v27, %v2632_v53 }
 0x181   : > { %v1798_v28 = vpack.c.bf16 %v950_v23, %v948_v22  ;;  %1872 = vst [vmem:[%s2662_s22 + $0x68] sm:$0xff] %v1818_v43  }
 0x183   : > { %1868 = vst [vmem:[%s2662_s22 + $0x48] sm:$0xff] %v1798_v28  }
 0x184   : > { %v972_v30 = vpop.f32.mrf.mxu3 }
 0x185   : > { %v973_v41 = vadd.f32 %v972_v30, %v2645_v4 }
 0x186   : > { %v952_v31 = vpop.f32.mrf.mxu2  ;;  %v776_v32 = vpop.f32.mrf.mxu0 }
 0x187   : > { %v777_v36 = vadd.f32 %v776_v32, %v2630_v51  ;;  %v865_v37 = vpop.f32.mrf.mxu1  ;;  %v953_v44 = vadd.f32 %v952_v31, %v2645_v4 }
 0x188   : > { %v866_v7 = vadd.f32 %v865_v37, %v2632_v53 }
 0x189   : > { %v1643_v39 = vpack.c.bf16 %v777_v36, %v775_v33 }
 0x18a   : > { %v1723_v40 = vpack.c.bf16 %v866_v7, %v864_v38 }
 0x18b   : > { %1839 = vst [vmem:[%s2648_s10 + $0x50] sm:$0xff] %v1643_v39  }
 0x18c   : > { %1854 = vst [vmem:[%s2652_s11 + $0x50] sm:$0xff] %v1723_v40   ;;  %v974_v16 = vpop.f32.mrf.mxu3 }
 0x18d   : > { %v975_v25 = vadd.f32 %v974_v16, %v2645_v4 }
 0x18e   : > { %v954_v42 = vpop.f32.mrf.mxu2  ;;  %v779_v48 = vpop.f32.mrf.mxu0 }
 0x18f   : > { %v955_v47 = vadd.f32 %v954_v42, %v2645_v4  ;;  %v1823_v49 = vpack.c.bf16 %v975_v25, %v973_v41  ;;  %v868_v34 = vpop.f32.mrf.mxu1  ;;  %v780_v56 = vadd.f32 %v779_v48, %v2630_v51 }
 0x190   : > { %v869_v57 = vadd.f32 %v868_v34, %v2632_v53 }
 0x191   : > { %v1803_v50 = vpack.c.bf16 %v955_v47, %v953_v44  ;;  %1873 = vst [vmem:[%s2662_s22 + $0x70] sm:$0xff] %v1823_v49  }
 0x193   : > { %1869 = vst [vmem:[%s2662_s22 + $0x50] sm:$0xff] %v1803_v50  }
 0x194   : > { %v977_v45 = vpop.f32.mrf.mxu3 }
 0x195   : > { %v978_v62 = vadd.f32 %v977_v45, %v2645_v4 }
 0x196   : > { %v957_v54 = vpop.f32.mrf.mxu2  ;;  %v781_v55 = vpop.f32.mrf.mxu0 }
 0x197   : > { %v782_v59 = vadd.f32 %v781_v55, %v2630_v51  ;;  %v870_v60 = vpop.f32.mrf.mxu1 }
 0x198   : > { %v871_v29 = vadd.f32 %v870_v60, %v2632_v53 }
 0x199   : > { %v1648_v61 = vpack.c.bf16 %v782_v59, %v780_v56 }
 0x19a   : > { %v1728_v51 = vpack.c.bf16 %v871_v29, %v869_v57 }
 0x19b   : > { %1840 = vst [vmem:[%s2648_s10 + $0x58] sm:$0xff] %v1648_v61   ;;  %s2136_s10 = scalar_lea.hbm %s2135_s23, 128 }
 0x19c   : > { %1855 = vst [vmem:[%s2652_s11 + $0x58] sm:$0xff] %v1728_v51   ;;  %v979_v53 = vpop.f32.mrf.mxu3  ;;  %p2137_p6 = scmp.ne.s32.totalorder %s2135_s23, %s2136_s10  ;;  %p2142_p13 = scmp.lt.s32.totalorder %s2140_s16, %s2136_s10 }
 0x19d   : > { %v980_v0 = vadd.f32 %v979_v53, %v2645_v4 }
 0x19e   : > { %v959_v63 = vpop.f32.mrf.mxu2  ;;  %p2138_p7 = pnand %p2137_p6, %p2367_p8  ;;  %p2143_p0 = por %p2142_p13, %p2141_p12 }
 0x1a0   : > { %p2139_p11 = pneg %p2138_p7 }
 0x1a2   : > { %p2144_p1 = pnand %p2143_p0, %p2139_p11 }
 0x1a4   : > { %2147 = shalt.err (!%p2144_p1)
}
 0x1a5   : > { %s2277_s30 = smov 64   ;;  %s2278_s29 = smov 4   ;;  %v958_v52 = vadd.f32 %v957_v54, %v2645_v4  ;;  %v960_v1 = vadd.f32 %v959_v63, %v2645_v4 }
 0x1a6   : > { %1910 = dma.vmem_to_hbm [thread:$0]  (%p2367_p8), %s2816_s8, 2048, %s1221_s24, %s2834_s18, %s2277_s30, %s2277_s30, %s2278_s29  }
 0x1a7   : > { %s1175_s1 = scalar_lea.sflag [#allocation4], %s2443_s3  ;;  %s2162_s7 = sshra.s32 %s1202_s26, 4  ;;  %s2163_s7 = int_to_ptr.hbm [resolvable:$true] %s2162_s7 }
 0x1a8   : > { %s2164_s9 = scalar_lea.hbm %s2163_s7, 128  ;;  %s2168_s10 = scalar_lea.hbm %s2925_s5, 256 }
 0x1a9   : > { %p2165_p2 = scmp.ne.s32.totalorder %s2163_s7, %s2164_s9  ;;  %p2169_p3 = scmp.lt.s32.totalorder %s2163_s7, %s2925_s5 }
 0x1aa   : > { %p2170_p6 = scmp.lt.s32.totalorder %s2168_s10, %s2164_s9 }
 0x1ab   : > { %p2166_p4 = pnand %p2165_p2, %p2367_p8 }
 0x1ac   : > { %p2171_p7 = por %p2170_p6, %p2169_p3 }
 0x1ad   : > { %p2167_p5 = pneg %p2166_p4 }
 0x1af   : > { %p2172_p11 = pnand %p2171_p7, %p2167_p5 }
 0x1b1   : > { %2175 = shalt.err (!%p2172_p11)
}
 0x1b2   : > { %1909 = dma.vmem_to_hbm [thread:$0]  (%p2367_p8), %s2823_s27, 2048, %s1202_s26, %s1175_s1, %s2277_s30, %s2277_s30, %s2278_s29   ;;  %v1828_v4 = vpack.c.bf16 %v980_v0, %v978_v62  ;;  %v1808_v8 = vpack.c.bf16 %v960_v1, %v958_v52 }
 0x1b3   : > { %s2190_s3 = sshra.s32 %s1240_s15, 4  ;;  %s2196_s20 = scalar_lea.hbm %s2955_s12, 256  ;;  %s2191_s3 = int_to_ptr.hbm [resolvable:$true] %s2190_s3 }
 0x1b4   : > { %1874 = vst [vmem:[%s2662_s22 + $0x78] sm:$0xff] %v1828_v4   ;;  %s2192_s8 = scalar_lea.hbm %s2191_s3, 128  ;;  %p2197_p1 = scmp.lt.s32.totalorder %s2191_s3, %s2955_s12 }
 0x1b5   : > { %1870 = vst [vmem:[%s2662_s22 + $0x58] sm:$0xff] %v1808_v8   ;;  %p2193_p12 = scmp.ne.s32.totalorder %s2191_s3, %s2192_s8  ;;  %p2198_p2 = scmp.lt.s32.totalorder %s2196_s20, %s2192_s8 }
 0x1b7   : > { %p2194_p13 = pnand %p2193_p12, %p2367_p8  ;;  %p2199_p4 = por %p2198_p2, %p2197_p1 }
 0x1b9   : > { %p2195_p0 = pneg %p2194_p13 }
 0x1bb   : > { %p2200_p5 = pnand %p2199_p4, %p2195_p0 }
 0x1bd   : > { %2203 = shalt.err (!%p2200_p5)
}
 0x1be   : > { %1911 = dma.vmem_to_hbm [thread:$0]  (%p2367_p8), %s1238_s17, 2048, %s1240_s15, %s2834_s18, %s2277_s30, %s2277_s30, %s2278_s29  }
 0x1bf PF: > { %s2957_s22 = sld [smem:[#allocation19_spill]]  ;;  %p1930_p3 = pnand %p1445_p10, %p2374_p9 }
 0x1c0   : > { %s2959_s1 = sld [smem:[#allocation21_spill]] }
 0x1c1   : > { %p1931_p6 = pneg %p1930_p3 }
 0x1c5   : > { %s1254_s7 = sand.u32 1, %s2957_s22  }
 0x1c6   : > { %s1255_s9 = scalar_lea.sflag [#allocation4], %s1254_s7 }
 0x1c7   : > { %2241 = dma.done.wait (%p1931_p6), %s1255_s9, 2048  }
 0x1c8   : > { %2243 = vsyncadd (%p1931_p6), %s1255_s9, 4294965248  ;;  %s2960_s13 = sadd.s32 4294967294, %s2959_s1  }
 0x1c9   : > { %s1264_s14 = sand.u32 1, %s2960_s13  }
 0x1ca   : > { %s1265_s23 = scalar_lea.sflag [#allocation12], %s1264_s14 }
 0x1cb   : > { %2245 = dma.done.wait (%p1931_p6), %s1265_s23, 4096  }
 0x1cc   : > { %2247 = vsyncadd (%p1931_p6), %s1265_s23, 4294963200  ;;  %s31_s29 = sadd.s32 1, %s2959_s1   ;;  %s2961_s15 = sld [smem:[#allocation20_spill]] }
 0x1cd   : > { %p28_p8 = scmp.ge.s32.totalorder %s31_s29, 4   ;;  %s2962_s26 = sld [smem:[#allocation25_spill]] }
 0x1ce   : > { %s2963_s17 = sld [smem:[#allocation22_spill]]  ;;  %s2964_s24 = smov %s2254_s25 }
 0x1cf   : > { %s2966_s27 = smov %s2266_s28 }
 0x1d0   :  { %30 = sbr.rel (!%p28_p8) target bundleno = 15 (0xf), region = 145 }
 0x1d2   : > { %s2965_s25 = smov %s2961_s15 }
 0x1d4   : > { %s2967_s28 = smov %s2963_s17 }
 0x1d5   :  { %1281 = vsyncpa [#allocation3], 1 }
 0x1d6   :  { %1283 = vsyncpa [#allocation3 + $0x1], 1 }
 0x1d7   :  { %1284 = vsyncpa [#allocation6], 1 }
 0x1d8   :  { %1286 = vsyncpa [#allocation6 + $0x1], 1 }
 0x1d9   :  { %1287 = vsyncpa [#allocation9], 1 }
 0x1da   :  { %1288 = vsyncpa [#allocation4], 1 }
 0x1db   :  { %1290 = vsyncpa [#allocation4 + $0x1], 1 }
 0x1dc   :  { %1291 = vsyncpa [#allocation12], 1 }
 0x1dd   :  { %1293 = vsyncpa [#allocation12 + $0x1], 1 }

</bundles_post_ra>
